<compile_context>
chip_gen: v6e
topology: v6e:2x2x1
jax: 0.10.0
libtpu: 0.0.40
codegen_flags: <defaults>
</compile_context>

<pallas_src>
import functools

import numpy as np
import jax
import jax.numpy as jnp
from jax import lax
from jax.experimental import pallas as pl
from jax.experimental.pallas import tpu as pltpu

KSIZE = 4          # every conv in the Encoder is 4x4
LEAKY_SLOPE = 0.2


# --------------------------------------------------------------------------
# In-kernel building block: one Conv2d + bias + BN-affine + optional leaky_relu
# --------------------------------------------------------------------------
def _conv_block(x, wcol_ref, shift_ref, *, h_in, h_out, stride, pad, act):
    """x: (h_in, W_in*C_in) -> (h_out, W_out*C_out).

    wcol_ref : (4, W_in*C_in, W_out*C_out)  per-kh column-folded weights
    shift_ref: (1, W_out*C_out)             folded bias + BN shift
    """
    # Row gather (kh tap + vertical stride + vertical zero-pad) as a 0/1
    # selection matmul: R_kh[i, j] = 1 iff j == stride*i + kh - pad.
    # Out-of-range rows give an all-zero R row == zero padding.
    ii = lax.broadcasted_iota(jnp.int32, (h_out, h_in), 0)
    jj = lax.broadcasted_iota(jnp.int32, (h_out, h_in), 1)

    acc = None
    for kh in range(KSIZE):
        if stride == 1 and pad == 0:
            # Degenerate case (last layer): plain unit-stride slice.
            y = x[kh:kh + h_out, :]
        else:
            r = jnp.where(jj == stride * ii + (kh - pad), 1.0, 0.0)
            r = r.astype(jnp.float32)
            y = jnp.dot(r, x, preferred_element_type=jnp.float32)
        t = jnp.dot(y, wcol_ref[kh], preferred_element_type=jnp.float32)
        acc = t if acc is None else acc + t

    acc = acc + shift_ref[...]                              # bias + BN folded
    if act:
        acc = jnp.where(acc >= 0, acc, LEAKY_SLOPE * acc)   # leaky_relu(0.2)
    return acc


def _encoder_kernel(x_ref, *refs, layer_cfg):
    o_ref = refs[-1]
    w_refs = refs[:-1]                                      # (wcol, shift) x 4
    x = x_ref[0]                                            # (H0, W0*C0)
    for li, (h_in, h_out, stride, pad, act) in enumerate(layer_cfg):
        x = _conv_block(x, w_refs[2 * li], w_refs[2 * li + 1],
                        h_in=h_in, h_out=h_out, stride=stride, pad=pad, act=act)
    o_ref[...] = x.reshape(o_ref.shape)


# --------------------------------------------------------------------------
# Host-side packing: fold bias/BN into weights, fold kw/stride/pad into a
# "column" weight matrix matching the kernel's (H, W*C) activation layout.
# --------------------------------------------------------------------------
def _fold_bn(bias, bn, cout):
    if bn is None:
        scale = jnp.ones((cout,), jnp.float32)
        shift = jnp.zeros((cout,), jnp.float32)
    else:
        gamma, beta, rmean, rvar, eps = bn
        scale = gamma / jnp.sqrt(rvar + eps)
        shift = beta - rmean * scale
    return scale, bias.astype(jnp.float32) * scale + shift


def _pack_conv(w_oihw, bias, bn, *, w_in, w_out, stride, pad):
    """wcol[kh, wi*Cin + c, wo*Cout + co] = W[co,c,kh,kw]*scale[co]
       where wi = stride*wo + kw - pad (only in-range wi are placed)."""
    cout, cin, kh_sz, kw_sz = w_oihw.shape
    scale, shift = _fold_bn(bias, bn, cout)
    w_scaled = w_oihw.astype(jnp.float32) * scale[:, None, None, None]  # (o,c,h,x)

    kw_i = np.arange(kw_sz)[:, None, None]
    wi_i = np.arange(w_in)[None, :, None]
    wo_i = np.arange(w_out)[None, None, :]
    sel = (wi_i == stride * wo_i + kw_i - pad).astype(np.float32)       # (x,i,w)

    wcol = jnp.einsum('xiw,ochx->hicwo', jnp.asarray(sel), w_scaled)
    wcol = wcol.reshape(kh_sz, w_in * cin, w_out * cout)
    shift_row = jnp.tile(shift, w_out).reshape(1, w_out * cout)
    return wcol, shift_row


# --------------------------------------------------------------------------
# Encoder forward (is_catdog=False): single fused pallas_call
# --------------------------------------------------------------------------
def encoder_forward(params, x_nchw):
    n, c, h, w = x_nchw.shape
    x2 = jnp.transpose(x_nchw, (0, 2, 3, 1)).reshape(n, h, w * c)  # (N, H, W*C)

    h1, w1 = h // 2, w // 2        # conv1_1: k4 s2 p1
    h2, w2 = h1 // 2, w1 // 2      # conv2
    h3, w3 = h2 // 2, w2 // 2      # conv3
    h4, w4 = h3 - 3, w3 - 3        # conv4:   k4 s1 p0
    assert h4 >= 1 and w4 >= 1

    wA, bA = params["conv1_1"]
    wB, bB = params["conv2"]
    wC, bC = params["conv3"]
    wD, bD = params["conv4"]
    z = wD.shape[0]

    wc1, sh1 = _pack_conv(wA, bA, None,               w_in=w,  w_out=w1, stride=2, pad=1)
    wc2, sh2 = _pack_conv(wB, bB, params["conv2_bn"], w_in=w1, w_out=w2, stride=2, pad=1)
    wc3, sh3 = _pack_conv(wC, bC, params["conv3_bn"], w_in=w2, w_out=w3, stride=2, pad=1)
    wc4, sh4 = _pack_conv(wD, bD, None,               w_in=w3, w_out=w4, stride=1, pad=0)

    layer_cfg = ((h,  h1, 2, 1, True),
                 (h1, h2, 2, 1, True),
                 (h2, h3, 2, 1, True),
                 (h3, h4, 1, 0, False))
    kernel = functools.partial(_encoder_kernel, layer_cfg=layer_cfg)

    def _full(arr):
        nd = arr.ndim
        return pl.BlockSpec(arr.shape, lambda i: (0,) * nd)

    out2 = pl.pallas_call(
        kernel,
        out_shape=jax.ShapeDtypeStruct((n, h4, w4 * z), jnp.float32),
        grid=(n,),
        in_specs=[pl.BlockSpec((1, h, w * c), lambda i: (i, 0, 0)),
                  _full(wc1), _full(sh1), _full(wc2), _full(sh2),
                  _full(wc3), _full(sh3), _full(wc4), _full(sh4)],
        out_specs=pl.BlockSpec((1, h4, w4 * z), lambda i: (i, 0, 0)),
        compiler_params=pltpu.CompilerParams(
            dimension_semantics=("parallel",)),     # batch across TCs (v7x)
    )(x2, wc1, sh1, wc2, sh2, wc3, sh3, wc4, sh4)

    out = out2.reshape(n, h4, w4, z)                # (N, H4, W4, Z)
    return jnp.transpose(out, (0, 3, 1, 2))         # NCHW


# --------------------------------------------------------------------------
# Parameter init (deterministic, mirrors Encoder.__init__ + normal_init)
# --------------------------------------------------------------------------
def init_encoder_params(key, z_size, d=8, channels=1, std=0.02):
    def conv_p(k, cout, cin, ksz):
        wgt = jax.random.normal(k, (cout, cin, ksz, ksz), jnp.float32) * std
        b = jnp.zeros((cout,), jnp.float32)
        return wgt, b

    def bn_p(cch):
        return (jnp.ones((cch,), jnp.float32),    # gamma
                jnp.zeros((cch,), jnp.float32),   # beta
                jnp.zeros((cch,), jnp.float32),   # running_mean
                jnp.ones((cch,), jnp.float32),    # running_var
                1e-5)                             # eps

    ks = jax.random.split(key, 4)
    return {
        "conv1_1": conv_p(ks[0], d // 2, channels, 4),
        "conv2": conv_p(ks[1], d * 2, d // 2, 4),
        "conv2_bn": bn_p(d * 2),
        "conv3": conv_p(ks[2], d * 4, d * 2, 4),
        "conv3_bn": bn_p(d * 4),
        "conv4": conv_p(ks[3], z_size, d * 4, 4),
    }


# --------------------------------------------------------------------------
# Pure-JAX reference (lax.conv) for correctness check
# --------------------------------------------------------------------------
def _ref_conv(x, w, b, stride, pad):
    dn = lax.conv_dimension_numbers(x.shape, w.shape, ("NCHW", "OIHW", "NCHW"))
    y = lax.conv_general_dilated(x, w, (stride, stride),
                                 [(pad, pad), (pad, pad)],
                                 dimension_numbers=dn,
                                 precision=lax.Precision.HIGHEST)
    return y + b.reshape(1, -1, 1, 1)


def _ref_bn(y, bn):
    gamma, beta, rmean, rvar, eps = bn
    rs = lambda v: v.reshape(1, -1, 1, 1)
    return (y - rs(rmean)) / jnp.sqrt(rs(rvar) + eps) * rs(gamma) + rs(beta)


def reference_forward(params, x):
    w, b = params["conv1_1"]
    x = jax.nn.leaky_relu(_ref_conv(x, w, b, 2, 1), 0.2)
    w, b = params["conv2"]
    x = jax.nn.leaky_relu(_ref_bn(_ref_conv(x, w, b, 2, 1), params["conv2_bn"]), 0.2)
    w, b = params["conv3"]
    x = jax.nn.leaky_relu(_ref_bn(_ref_conv(x, w, b, 2, 1), params["conv3_bn"]), 0.2)
    w, b = params["conv4"]
    return _ref_conv(x, w, b, 1, 0)


if __name__ == "__main__":
    key = jax.random.PRNGKey(0)
    kx, kp = jax.random.split(key)

    # batch=2, channels=1, 32x32 spatial (required by the 4x stride-2/valid
    # conv stack), d=8, z_size=16.
    x = jax.random.normal(kx, (2, 1, 32, 32), jnp.float32)   # NCHW, like PyTorch
    params = init_encoder_params(kp, z_size=16, d=8, channels=1)

    out = jax.block_until_ready(jax.jit(encoder_forward)(params, x))
    assert out.shape == (2, 16, 1, 1), out.shape

    ref = jax.block_until_ready(reference_forward(params, x))
    assert jnp.allclose(out, ref, rtol=2e-2, atol=1e-4), \
        float(jnp.max(jnp.abs(out - ref)))

    print("KERNEL_OK")
</pallas_src>

<mosaic_0001>
module attributes {stable_mosaic.version = 11 : i64} {
  func.func @_encoder_kernel(%arg0: i32, %arg1: memref<1x32x32xf32, #tpu.memory_space<vmem>>, %arg2: memref<4x32x64xf32, #tpu.memory_space<vmem>>, %arg3: memref<1x64xf32, #tpu.memory_space<vmem>>, %arg4: memref<4x64x128xf32, #tpu.memory_space<vmem>>, %arg5: memref<1x128xf32, #tpu.memory_space<vmem>>, %arg6: memref<4x128x128xf32, #tpu.memory_space<vmem>>, %arg7: memref<1x128xf32, #tpu.memory_space<vmem>>, %arg8: memref<4x128x16xf32, #tpu.memory_space<vmem>>, %arg9: memref<1x16xf32, #tpu.memory_space<vmem>>, %arg10: memref<1x1x16xf32, #tpu.memory_space<vmem>>) attributes {dimension_semantics = [#tpu.dimension_semantics<parallel>], iteration_bounds = array<i64: 2>, scalar_prefetch = 0 : i64, scratch_operands = 0 : i64, tpu.core_type = #tpu.core_type<tc>, window_params = [{transform_indices = @transform_0, window_bounds = array<i64: 1, 32, 32>}, {pipeline_mode = #tpu.pipeline_mode<synchronous>, transform_indices = @transform_1, window_bounds = array<i64: 4, 32, 64>}, {pipeline_mode = #tpu.pipeline_mode<synchronous>, transform_indices = @transform_2, window_bounds = array<i64: 1, 64>}, {pipeline_mode = #tpu.pipeline_mode<synchronous>, transform_indices = @transform_3, window_bounds = array<i64: 4, 64, 128>}, {pipeline_mode = #tpu.pipeline_mode<synchronous>, transform_indices = @transform_4, window_bounds = array<i64: 1, 128>}, {pipeline_mode = #tpu.pipeline_mode<synchronous>, transform_indices = @transform_5, window_bounds = array<i64: 4, 128, 128>}, {pipeline_mode = #tpu.pipeline_mode<synchronous>, transform_indices = @transform_6, window_bounds = array<i64: 1, 128>}, {pipeline_mode = #tpu.pipeline_mode<synchronous>, transform_indices = @transform_7, window_bounds = array<i64: 4, 128, 16>}, {pipeline_mode = #tpu.pipeline_mode<synchronous>, transform_indices = @transform_8, window_bounds = array<i64: 1, 16>}, {transform_indices = @transform_9, window_bounds = array<i64: 1, 1, 16>}]} {
    %c0 = arith.constant 0 : index
    %c0_0 = arith.constant 0 : index
    %c0_1 = arith.constant 0 : index
    %0 = vector.load %arg1[%c0, %c0_0, %c0_1] : memref<1x32x32xf32, #tpu.memory_space<vmem>>, vector<1x32x32xf32>
    %1 = vector.shape_cast %0 : vector<1x32x32xf32> to vector<32x32xf32>
    %2 = tpu.iota {dimensions = array<i32: 0>} : vector<16x32xi32>
    %3 = tpu.iota {dimensions = array<i32: 1>} : vector<16x32xi32>
    %c2_i32 = arith.constant 2 : i32
    %4 = vector.broadcast %c2_i32 : i32 to vector<16x32xi32>
    %5 = arith.muli %4, %2 : vector<16x32xi32>
    %c-1_i32 = arith.constant -1 : i32
    %6 = vector.broadcast %c-1_i32 : i32 to vector<16x32xi32>
    %7 = arith.addi %5, %6 : vector<16x32xi32>
    %8 = arith.cmpi eq, %3, %7 : vector<16x32xi32>
    %cst = arith.constant 1.000000e+00 : f32
    %cst_2 = arith.constant 0.000000e+00 : f32
    %9 = vector.broadcast %cst : f32 to vector<16x32xf32>
    %10 = vector.broadcast %cst_2 : f32 to vector<16x32xf32>
    %11 = arith.select %8, %9, %10 : vector<16x32xi1>, vector<16x32xf32>
    %cst_3 = arith.constant dense<0.000000e+00> : vector<16x32xf32>
    %12 = tpu.matmul %11, %1, %cst_3 {dimension_numbers = #tpu.dot_dimension_numbers<[1], [0], [0], [1], [0, 0, 1, 1], [], []>} : vector<16x32xf32>, vector<32x32xf32>, vector<16x32xf32> -> vector<16x32xf32>
    %c0_4 = arith.constant 0 : index
    %c0_5 = arith.constant 0 : index
    %c0_6 = arith.constant 0 : index
    %13 = vector.load %arg2[%c0_4, %c0_5, %c0_6] : memref<4x32x64xf32, #tpu.memory_space<vmem>>, vector<1x32x64xf32>
    %14 = vector.shape_cast %13 : vector<1x32x64xf32> to vector<32x64xf32>
    %cst_7 = arith.constant dense<0.000000e+00> : vector<16x64xf32>
    %15 = tpu.matmul %12, %14, %cst_7 {dimension_numbers = #tpu.dot_dimension_numbers<[1], [0], [0], [1], [0, 0, 1, 1], [], []>} : vector<16x32xf32>, vector<32x64xf32>, vector<16x64xf32> -> vector<16x64xf32>
    %c2_i32_8 = arith.constant 2 : i32
    %16 = vector.broadcast %c2_i32_8 : i32 to vector<16x32xi32>
    %17 = arith.muli %16, %2 : vector<16x32xi32>
    %c0_i32 = arith.constant 0 : i32
    %18 = vector.broadcast %c0_i32 : i32 to vector<16x32xi32>
    %19 = arith.addi %17, %18 : vector<16x32xi32>
    %20 = arith.cmpi eq, %3, %19 : vector<16x32xi32>
    %cst_9 = arith.constant 1.000000e+00 : f32
    %cst_10 = arith.constant 0.000000e+00 : f32
    %21 = vector.broadcast %cst_9 : f32 to vector<16x32xf32>
    %22 = vector.broadcast %cst_10 : f32 to vector<16x32xf32>
    %23 = arith.select %20, %21, %22 : vector<16x32xi1>, vector<16x32xf32>
    %cst_11 = arith.constant dense<0.000000e+00> : vector<16x32xf32>
    %24 = tpu.matmul %23, %1, %cst_11 {dimension_numbers = #tpu.dot_dimension_numbers<[1], [0], [0], [1], [0, 0, 1, 1], [], []>} : vector<16x32xf32>, vector<32x32xf32>, vector<16x32xf32> -> vector<16x32xf32>
    %c1 = arith.constant 1 : index
    %c0_12 = arith.constant 0 : index
    %c0_13 = arith.constant 0 : index
    %25 = vector.load %arg2[%c1, %c0_12, %c0_13] : memref<4x32x64xf32, #tpu.memory_space<vmem>>, vector<1x32x64xf32>
    %26 = vector.shape_cast %25 : vector<1x32x64xf32> to vector<32x64xf32>
    %cst_14 = arith.constant dense<0.000000e+00> : vector<16x64xf32>
    %27 = tpu.matmul %24, %26, %cst_14 {dimension_numbers = #tpu.dot_dimension_numbers<[1], [0], [0], [1], [0, 0, 1, 1], [], []>} : vector<16x32xf32>, vector<32x64xf32>, vector<16x64xf32> -> vector<16x64xf32>
    %28 = arith.addf %15, %27 : vector<16x64xf32>
    %c2_i32_15 = arith.constant 2 : i32
    %29 = vector.broadcast %c2_i32_15 : i32 to vector<16x32xi32>
    %30 = arith.muli %29, %2 : vector<16x32xi32>
    %c1_i32 = arith.constant 1 : i32
    %31 = vector.broadcast %c1_i32 : i32 to vector<16x32xi32>
    %32 = arith.addi %30, %31 : vector<16x32xi32>
    %33 = arith.cmpi eq, %3, %32 : vector<16x32xi32>
    %cst_16 = arith.constant 1.000000e+00 : f32
    %cst_17 = arith.constant 0.000000e+00 : f32
    %34 = vector.broadcast %cst_16 : f32 to vector<16x32xf32>
    %35 = vector.broadcast %cst_17 : f32 to vector<16x32xf32>
    %36 = arith.select %33, %34, %35 : vector<16x32xi1>, vector<16x32xf32>
    %cst_18 = arith.constant dense<0.000000e+00> : vector<16x32xf32>
    %37 = tpu.matmul %36, %1, %cst_18 {dimension_numbers = #tpu.dot_dimension_numbers<[1], [0], [0], [1], [0, 0, 1, 1], [], []>} : vector<16x32xf32>, vector<32x32xf32>, vector<16x32xf32> -> vector<16x32xf32>
    %c2 = arith.constant 2 : index
    %c0_19 = arith.constant 0 : index
    %c0_20 = arith.constant 0 : index
    %38 = vector.load %arg2[%c2, %c0_19, %c0_20] : memref<4x32x64xf32, #tpu.memory_space<vmem>>, vector<1x32x64xf32>
    %39 = vector.shape_cast %38 : vector<1x32x64xf32> to vector<32x64xf32>
    %cst_21 = arith.constant dense<0.000000e+00> : vector<16x64xf32>
    %40 = tpu.matmul %37, %39, %cst_21 {dimension_numbers = #tpu.dot_dimension_numbers<[1], [0], [0], [1], [0, 0, 1, 1], [], []>} : vector<16x32xf32>, vector<32x64xf32>, vector<16x64xf32> -> vector<16x64xf32>
    %41 = arith.addf %28, %40 : vector<16x64xf32>
    %c2_i32_22 = arith.constant 2 : i32
    %42 = vector.broadcast %c2_i32_22 : i32 to vector<16x32xi32>
    %43 = arith.muli %42, %2 : vector<16x32xi32>
    %c2_i32_23 = arith.constant 2 : i32
    %44 = vector.broadcast %c2_i32_23 : i32 to vector<16x32xi32>
    %45 = arith.addi %43, %44 : vector<16x32xi32>
    %46 = arith.cmpi eq, %3, %45 : vector<16x32xi32>
    %cst_24 = arith.constant 1.000000e+00 : f32
    %cst_25 = arith.constant 0.000000e+00 : f32
    %47 = vector.broadcast %cst_24 : f32 to vector<16x32xf32>
    %48 = vector.broadcast %cst_25 : f32 to vector<16x32xf32>
    %49 = arith.select %46, %47, %48 : vector<16x32xi1>, vector<16x32xf32>
    %cst_26 = arith.constant dense<0.000000e+00> : vector<16x32xf32>
    %50 = tpu.matmul %49, %1, %cst_26 {dimension_numbers = #tpu.dot_dimension_numbers<[1], [0], [0], [1], [0, 0, 1, 1], [], []>} : vector<16x32xf32>, vector<32x32xf32>, vector<16x32xf32> -> vector<16x32xf32>
    %c3 = arith.constant 3 : index
    %c0_27 = arith.constant 0 : index
    %c0_28 = arith.constant 0 : index
    %51 = vector.load %arg2[%c3, %c0_27, %c0_28] : memref<4x32x64xf32, #tpu.memory_space<vmem>>, vector<1x32x64xf32>
    %52 = vector.shape_cast %51 : vector<1x32x64xf32> to vector<32x64xf32>
    %cst_29 = arith.constant dense<0.000000e+00> : vector<16x64xf32>
    %53 = tpu.matmul %50, %52, %cst_29 {dimension_numbers = #tpu.dot_dimension_numbers<[1], [0], [0], [1], [0, 0, 1, 1], [], []>} : vector<16x32xf32>, vector<32x64xf32>, vector<16x64xf32> -> vector<16x64xf32>
    %54 = arith.addf %41, %53 : vector<16x64xf32>
    %c0_30 = arith.constant 0 : index
    %c0_31 = arith.constant 0 : index
    %55 = vector.load %arg3[%c0_30, %c0_31] : memref<1x64xf32, #tpu.memory_space<vmem>>, vector<1x64xf32>
    %56 = vector.broadcast %55 : vector<1x64xf32> to vector<16x64xf32>
    %57 = arith.addf %54, %56 : vector<16x64xf32>
    %cst_32 = arith.constant 0.000000e+00 : f32
    %58 = vector.broadcast %cst_32 : f32 to vector<16x64xf32>
    %59 = arith.cmpf oge, %57, %58 : vector<16x64xf32>
    %cst_33 = arith.constant 2.000000e-01 : f32
    %60 = vector.broadcast %cst_33 : f32 to vector<16x64xf32>
    %61 = arith.mulf %60, %57 : vector<16x64xf32>
    %62 = arith.select %59, %57, %61 : vector<16x64xi1>, vector<16x64xf32>
    %63 = tpu.iota {dimensions = array<i32: 0>} : vector<8x16xi32>
    %64 = tpu.iota {dimensions = array<i32: 1>} : vector<8x16xi32>
    %c2_i32_34 = arith.constant 2 : i32
    %65 = vector.broadcast %c2_i32_34 : i32 to vector<8x16xi32>
    %66 = arith.muli %65, %63 : vector<8x16xi32>
    %c-1_i32_35 = arith.constant -1 : i32
    %67 = vector.broadcast %c-1_i32_35 : i32 to vector<8x16xi32>
    %68 = arith.addi %66, %67 : vector<8x16xi32>
    %69 = arith.cmpi eq, %64, %68 : vector<8x16xi32>
    %cst_36 = arith.constant 1.000000e+00 : f32
    %cst_37 = arith.constant 0.000000e+00 : f32
    %70 = vector.broadcast %cst_36 : f32 to vector<8x16xf32>
    %71 = vector.broadcast %cst_37 : f32 to vector<8x16xf32>
    %72 = arith.select %69, %70, %71 : vector<8x16xi1>, vector<8x16xf32>
    %cst_38 = arith.constant dense<0.000000e+00> : vector<8x64xf32>
    %73 = tpu.matmul %72, %62, %cst_38 {dimension_numbers = #tpu.dot_dimension_numbers<[1], [0], [0], [1], [0, 0, 1, 1], [], []>} : vector<8x16xf32>, vector<16x64xf32>, vector<8x64xf32> -> vector<8x64xf32>
    %c0_39 = arith.constant 0 : index
    %c0_40 = arith.constant 0 : index
    %c0_41 = arith.constant 0 : index
    %74 = vector.load %arg4[%c0_39, %c0_40, %c0_41] : memref<4x64x128xf32, #tpu.memory_space<vmem>>, vector<1x64x128xf32>
    %75 = vector.shape_cast %74 : vector<1x64x128xf32> to vector<64x128xf32>
    %cst_42 = arith.constant dense<0.000000e+00> : vector<8x128xf32>
    %76 = tpu.matmul %73, %75, %cst_42 {dimension_numbers = #tpu.dot_dimension_numbers<[1], [0], [0], [1], [0, 0, 1, 1], [], []>} : vector<8x64xf32>, vector<64x128xf32>, vector<8x128xf32> -> vector<8x128xf32>
    %c2_i32_43 = arith.constant 2 : i32
    %77 = vector.broadcast %c2_i32_43 : i32 to vector<8x16xi32>
    %78 = arith.muli %77, %63 : vector<8x16xi32>
    %c0_i32_44 = arith.constant 0 : i32
    %79 = vector.broadcast %c0_i32_44 : i32 to vector<8x16xi32>
    %80 = arith.addi %78, %79 : vector<8x16xi32>
    %81 = arith.cmpi eq, %64, %80 : vector<8x16xi32>
    %cst_45 = arith.constant 1.000000e+00 : f32
    %cst_46 = arith.constant 0.000000e+00 : f32
    %82 = vector.broadcast %cst_45 : f32 to vector<8x16xf32>
    %83 = vector.broadcast %cst_46 : f32 to vector<8x16xf32>
    %84 = arith.select %81, %82, %83 : vector<8x16xi1>, vector<8x16xf32>
    %cst_47 = arith.constant dense<0.000000e+00> : vector<8x64xf32>
    %85 = tpu.matmul %84, %62, %cst_47 {dimension_numbers = #tpu.dot_dimension_numbers<[1], [0], [0], [1], [0, 0, 1, 1], [], []>} : vector<8x16xf32>, vector<16x64xf32>, vector<8x64xf32> -> vector<8x64xf32>
    %c1_48 = arith.constant 1 : index
    %c0_49 = arith.constant 0 : index
    %c0_50 = arith.constant 0 : index
    %86 = vector.load %arg4[%c1_48, %c0_49, %c0_50] : memref<4x64x128xf32, #tpu.memory_space<vmem>>, vector<1x64x128xf32>
    %87 = vector.shape_cast %86 : vector<1x64x128xf32> to vector<64x128xf32>
    %cst_51 = arith.constant dense<0.000000e+00> : vector<8x128xf32>
    %88 = tpu.matmul %85, %87, %cst_51 {dimension_numbers = #tpu.dot_dimension_numbers<[1], [0], [0], [1], [0, 0, 1, 1], [], []>} : vector<8x64xf32>, vector<64x128xf32>, vector<8x128xf32> -> vector<8x128xf32>
    %89 = arith.addf %76, %88 : vector<8x128xf32>
    %c2_i32_52 = arith.constant 2 : i32
    %90 = vector.broadcast %c2_i32_52 : i32 to vector<8x16xi32>
    %91 = arith.muli %90, %63 : vector<8x16xi32>
    %c1_i32_53 = arith.constant 1 : i32
    %92 = vector.broadcast %c1_i32_53 : i32 to vector<8x16xi32>
    %93 = arith.addi %91, %92 : vector<8x16xi32>
    %94 = arith.cmpi eq, %64, %93 : vector<8x16xi32>
    %cst_54 = arith.constant 1.000000e+00 : f32
    %cst_55 = arith.constant 0.000000e+00 : f32
    %95 = vector.broadcast %cst_54 : f32 to vector<8x16xf32>
    %96 = vector.broadcast %cst_55 : f32 to vector<8x16xf32>
    %97 = arith.select %94, %95, %96 : vector<8x16xi1>, vector<8x16xf32>
    %cst_56 = arith.constant dense<0.000000e+00> : vector<8x64xf32>
    %98 = tpu.matmul %97, %62, %cst_56 {dimension_numbers = #tpu.dot_dimension_numbers<[1], [0], [0], [1], [0, 0, 1, 1], [], []>} : vector<8x16xf32>, vector<16x64xf32>, vector<8x64xf32> -> vector<8x64xf32>
    %c2_57 = arith.constant 2 : index
    %c0_58 = arith.constant 0 : index
    %c0_59 = arith.constant 0 : index
    %99 = vector.load %arg4[%c2_57, %c0_58, %c0_59] : memref<4x64x128xf32, #tpu.memory_space<vmem>>, vector<1x64x128xf32>
    %100 = vector.shape_cast %99 : vector<1x64x128xf32> to vector<64x128xf32>
    %cst_60 = arith.constant dense<0.000000e+00> : vector<8x128xf32>
    %101 = tpu.matmul %98, %100, %cst_60 {dimension_numbers = #tpu.dot_dimension_numbers<[1], [0], [0], [1], [0, 0, 1, 1], [], []>} : vector<8x64xf32>, vector<64x128xf32>, vector<8x128xf32> -> vector<8x128xf32>
    %102 = arith.addf %89, %101 : vector<8x128xf32>
    %c2_i32_61 = arith.constant 2 : i32
    %103 = vector.broadcast %c2_i32_61 : i32 to vector<8x16xi32>
    %104 = arith.muli %103, %63 : vector<8x16xi32>
    %c2_i32_62 = arith.constant 2 : i32
    %105 = vector.broadcast %c2_i32_62 : i32 to vector<8x16xi32>
    %106 = arith.addi %104, %105 : vector<8x16xi32>
    %107 = arith.cmpi eq, %64, %106 : vector<8x16xi32>
    %cst_63 = arith.constant 1.000000e+00 : f32
    %cst_64 = arith.constant 0.000000e+00 : f32
    %108 = vector.broadcast %cst_63 : f32 to vector<8x16xf32>
    %109 = vector.broadcast %cst_64 : f32 to vector<8x16xf32>
    %110 = arith.select %107, %108, %109 : vector<8x16xi1>, vector<8x16xf32>
    %cst_65 = arith.constant dense<0.000000e+00> : vector<8x64xf32>
    %111 = tpu.matmul %110, %62, %cst_65 {dimension_numbers = #tpu.dot_dimension_numbers<[1], [0], [0], [1], [0, 0, 1, 1], [], []>} : vector<8x16xf32>, vector<16x64xf32>, vector<8x64xf32> -> vector<8x64xf32>
    %c3_66 = arith.constant 3 : index
    %c0_67 = arith.constant 0 : index
    %c0_68 = arith.constant 0 : index
    %112 = vector.load %arg4[%c3_66, %c0_67, %c0_68] : memref<4x64x128xf32, #tpu.memory_space<vmem>>, vector<1x64x128xf32>
    %113 = vector.shape_cast %112 : vector<1x64x128xf32> to vector<64x128xf32>
    %cst_69 = arith.constant dense<0.000000e+00> : vector<8x128xf32>
    %114 = tpu.matmul %111, %113, %cst_69 {dimension_numbers = #tpu.dot_dimension_numbers<[1], [0], [0], [1], [0, 0, 1, 1], [], []>} : vector<8x64xf32>, vector<64x128xf32>, vector<8x128xf32> -> vector<8x128xf32>
    %115 = arith.addf %102, %114 : vector<8x128xf32>
    %c0_70 = arith.constant 0 : index
    %c0_71 = arith.constant 0 : index
    %116 = vector.load %arg5[%c0_70, %c0_71] : memref<1x128xf32, #tpu.memory_space<vmem>>, vector<1x128xf32>
    %117 = vector.broadcast %116 : vector<1x128xf32> to vector<8x128xf32>
    %118 = arith.addf %115, %117 : vector<8x128xf32>
    %cst_72 = arith.constant 0.000000e+00 : f32
    %119 = vector.broadcast %cst_72 : f32 to vector<8x128xf32>
    %120 = arith.cmpf oge, %118, %119 : vector<8x128xf32>
    %cst_73 = arith.constant 2.000000e-01 : f32
    %121 = vector.broadcast %cst_73 : f32 to vector<8x128xf32>
    %122 = arith.mulf %121, %118 : vector<8x128xf32>
    %123 = arith.select %120, %118, %122 : vector<8x128xi1>, vector<8x128xf32>
    %124 = tpu.iota {dimensions = array<i32: 0>} : vector<4x8xi32>
    %125 = tpu.iota {dimensions = array<i32: 1>} : vector<4x8xi32>
    %c2_i32_74 = arith.constant 2 : i32
    %126 = vector.broadcast %c2_i32_74 : i32 to vector<4x8xi32>
    %127 = arith.muli %126, %124 : vector<4x8xi32>
    %c-1_i32_75 = arith.constant -1 : i32
    %128 = vector.broadcast %c-1_i32_75 : i32 to vector<4x8xi32>
    %129 = arith.addi %127, %128 : vector<4x8xi32>
    %130 = arith.cmpi eq, %125, %129 : vector<4x8xi32>
    %cst_76 = arith.constant 1.000000e+00 : f32
    %cst_77 = arith.constant 0.000000e+00 : f32
    %131 = vector.broadcast %cst_76 : f32 to vector<4x8xf32>
    %132 = vector.broadcast %cst_77 : f32 to vector<4x8xf32>
    %133 = arith.select %130, %131, %132 : vector<4x8xi1>, vector<4x8xf32>
    %cst_78 = arith.constant dense<0.000000e+00> : vector<4x128xf32>
    %134 = tpu.matmul %133, %123, %cst_78 {dimension_numbers = #tpu.dot_dimension_numbers<[1], [0], [0], [1], [0, 0, 1, 1], [], []>} : vector<4x8xf32>, vector<8x128xf32>, vector<4x128xf32> -> vector<4x128xf32>
    %c0_79 = arith.constant 0 : index
    %c0_80 = arith.constant 0 : index
    %c0_81 = arith.constant 0 : index
    %135 = vector.load %arg6[%c0_79, %c0_80, %c0_81] : memref<4x128x128xf32, #tpu.memory_space<vmem>>, vector<1x128x128xf32>
    %136 = vector.shape_cast %135 : vector<1x128x128xf32> to vector<128x128xf32>
    %cst_82 = arith.constant dense<0.000000e+00> : vector<4x128xf32>
    %137 = tpu.matmul %134, %136, %cst_82 {dimension_numbers = #tpu.dot_dimension_numbers<[1], [0], [0], [1], [0, 0, 1, 1], [], []>} : vector<4x128xf32>, vector<128x128xf32>, vector<4x128xf32> -> vector<4x128xf32>
    %c2_i32_83 = arith.constant 2 : i32
    %138 = vector.broadcast %c2_i32_83 : i32 to vector<4x8xi32>
    %139 = arith.muli %138, %124 : vector<4x8xi32>
    %c0_i32_84 = arith.constant 0 : i32
    %140 = vector.broadcast %c0_i32_84 : i32 to vector<4x8xi32>
    %141 = arith.addi %139, %140 : vector<4x8xi32>
    %142 = arith.cmpi eq, %125, %141 : vector<4x8xi32>
    %cst_85 = arith.constant 1.000000e+00 : f32
    %cst_86 = arith.constant 0.000000e+00 : f32
    %143 = vector.broadcast %cst_85 : f32 to vector<4x8xf32>
    %144 = vector.broadcast %cst_86 : f32 to vector<4x8xf32>
    %145 = arith.select %142, %143, %144 : vector<4x8xi1>, vector<4x8xf32>
    %cst_87 = arith.constant dense<0.000000e+00> : vector<4x128xf32>
    %146 = tpu.matmul %145, %123, %cst_87 {dimension_numbers = #tpu.dot_dimension_numbers<[1], [0], [0], [1], [0, 0, 1, 1], [], []>} : vector<4x8xf32>, vector<8x128xf32>, vector<4x128xf32> -> vector<4x128xf32>
    %c1_88 = arith.constant 1 : index
    %c0_89 = arith.constant 0 : index
    %c0_90 = arith.constant 0 : index
    %147 = vector.load %arg6[%c1_88, %c0_89, %c0_90] : memref<4x128x128xf32, #tpu.memory_space<vmem>>, vector<1x128x128xf32>
    %148 = vector.shape_cast %147 : vector<1x128x128xf32> to vector<128x128xf32>
    %cst_91 = arith.constant dense<0.000000e+00> : vector<4x128xf32>
    %149 = tpu.matmul %146, %148, %cst_91 {dimension_numbers = #tpu.dot_dimension_numbers<[1], [0], [0], [1], [0, 0, 1, 1], [], []>} : vector<4x128xf32>, vector<128x128xf32>, vector<4x128xf32> -> vector<4x128xf32>
    %150 = arith.addf %137, %149 : vector<4x128xf32>
    %c2_i32_92 = arith.constant 2 : i32
    %151 = vector.broadcast %c2_i32_92 : i32 to vector<4x8xi32>
    %152 = arith.muli %151, %124 : vector<4x8xi32>
    %c1_i32_93 = arith.constant 1 : i32
    %153 = vector.broadcast %c1_i32_93 : i32 to vector<4x8xi32>
    %154 = arith.addi %152, %153 : vector<4x8xi32>
    %155 = arith.cmpi eq, %125, %154 : vector<4x8xi32>
    %cst_94 = arith.constant 1.000000e+00 : f32
    %cst_95 = arith.constant 0.000000e+00 : f32
    %156 = vector.broadcast %cst_94 : f32 to vector<4x8xf32>
    %157 = vector.broadcast %cst_95 : f32 to vector<4x8xf32>
    %158 = arith.select %155, %156, %157 : vector<4x8xi1>, vector<4x8xf32>
    %cst_96 = arith.constant dense<0.000000e+00> : vector<4x128xf32>
    %159 = tpu.matmul %158, %123, %cst_96 {dimension_numbers = #tpu.dot_dimension_numbers<[1], [0], [0], [1], [0, 0, 1, 1], [], []>} : vector<4x8xf32>, vector<8x128xf32>, vector<4x128xf32> -> vector<4x128xf32>
    %c2_97 = arith.constant 2 : index
    %c0_98 = arith.constant 0 : index
    %c0_99 = arith.constant 0 : index
    %160 = vector.load %arg6[%c2_97, %c0_98, %c0_99] : memref<4x128x128xf32, #tpu.memory_space<vmem>>, vector<1x128x128xf32>
    %161 = vector.shape_cast %160 : vector<1x128x128xf32> to vector<128x128xf32>
    %cst_100 = arith.constant dense<0.000000e+00> : vector<4x128xf32>
    %162 = tpu.matmul %159, %161, %cst_100 {dimension_numbers = #tpu.dot_dimension_numbers<[1], [0], [0], [1], [0, 0, 1, 1], [], []>} : vector<4x128xf32>, vector<128x128xf32>, vector<4x128xf32> -> vector<4x128xf32>
    %163 = arith.addf %150, %162 : vector<4x128xf32>
    %c2_i32_101 = arith.constant 2 : i32
    %164 = vector.broadcast %c2_i32_101 : i32 to vector<4x8xi32>
    %165 = arith.muli %164, %124 : vector<4x8xi32>
    %c2_i32_102 = arith.constant 2 : i32
    %166 = vector.broadcast %c2_i32_102 : i32 to vector<4x8xi32>
    %167 = arith.addi %165, %166 : vector<4x8xi32>
    %168 = arith.cmpi eq, %125, %167 : vector<4x8xi32>
    %cst_103 = arith.constant 1.000000e+00 : f32
    %cst_104 = arith.constant 0.000000e+00 : f32
    %169 = vector.broadcast %cst_103 : f32 to vector<4x8xf32>
    %170 = vector.broadcast %cst_104 : f32 to vector<4x8xf32>
    %171 = arith.select %168, %169, %170 : vector<4x8xi1>, vector<4x8xf32>
    %cst_105 = arith.constant dense<0.000000e+00> : vector<4x128xf32>
    %172 = tpu.matmul %171, %123, %cst_105 {dimension_numbers = #tpu.dot_dimension_numbers<[1], [0], [0], [1], [0, 0, 1, 1], [], []>} : vector<4x8xf32>, vector<8x128xf32>, vector<4x128xf32> -> vector<4x128xf32>
    %c3_106 = arith.constant 3 : index
    %c0_107 = arith.constant 0 : index
    %c0_108 = arith.constant 0 : index
    %173 = vector.load %arg6[%c3_106, %c0_107, %c0_108] : memref<4x128x128xf32, #tpu.memory_space<vmem>>, vector<1x128x128xf32>
    %174 = vector.shape_cast %173 : vector<1x128x128xf32> to vector<128x128xf32>
    %cst_109 = arith.constant dense<0.000000e+00> : vector<4x128xf32>
    %175 = tpu.matmul %172, %174, %cst_109 {dimension_numbers = #tpu.dot_dimension_numbers<[1], [0], [0], [1], [0, 0, 1, 1], [], []>} : vector<4x128xf32>, vector<128x128xf32>, vector<4x128xf32> -> vector<4x128xf32>
    %176 = arith.addf %163, %175 : vector<4x128xf32>
    %c0_110 = arith.constant 0 : index
    %c0_111 = arith.constant 0 : index
    %177 = vector.load %arg7[%c0_110, %c0_111] : memref<1x128xf32, #tpu.memory_space<vmem>>, vector<1x128xf32>
    %178 = vector.broadcast %177 : vector<1x128xf32> to vector<4x128xf32>
    %179 = arith.addf %176, %178 : vector<4x128xf32>
    %cst_112 = arith.constant 0.000000e+00 : f32
    %180 = vector.broadcast %cst_112 : f32 to vector<4x128xf32>
    %181 = arith.cmpf oge, %179, %180 : vector<4x128xf32>
    %cst_113 = arith.constant 2.000000e-01 : f32
    %182 = vector.broadcast %cst_113 : f32 to vector<4x128xf32>
    %183 = arith.mulf %182, %179 : vector<4x128xf32>
    %184 = arith.select %181, %179, %183 : vector<4x128xi1>, vector<4x128xf32>
    %185 = vector.extract_strided_slice %184 {offsets = [0, 0], sizes = [1, 128], strides = [1, 1]} : vector<4x128xf32> to vector<1x128xf32>
    %c0_114 = arith.constant 0 : index
    %c0_115 = arith.constant 0 : index
    %c0_116 = arith.constant 0 : index
    %186 = vector.load %arg8[%c0_114, %c0_115, %c0_116] : memref<4x128x16xf32, #tpu.memory_space<vmem>>, vector<1x128x16xf32>
    %187 = vector.shape_cast %186 : vector<1x128x16xf32> to vector<128x16xf32>
    %cst_117 = arith.constant dense<0.000000e+00> : vector<1x16xf32>
    %188 = tpu.matmul %185, %187, %cst_117 {dimension_numbers = #tpu.dot_dimension_numbers<[1], [0], [0], [1], [0, 0, 1, 1], [], []>} : vector<1x128xf32>, vector<128x16xf32>, vector<1x16xf32> -> vector<1x16xf32>
    %189 = vector.extract_strided_slice %184 {offsets = [1, 0], sizes = [1, 128], strides = [1, 1]} : vector<4x128xf32> to vector<1x128xf32>
    %c1_118 = arith.constant 1 : index
    %c0_119 = arith.constant 0 : index
    %c0_120 = arith.constant 0 : index
    %190 = vector.load %arg8[%c1_118, %c0_119, %c0_120] : memref<4x128x16xf32, #tpu.memory_space<vmem>>, vector<1x128x16xf32>
    %191 = vector.shape_cast %190 : vector<1x128x16xf32> to vector<128x16xf32>
    %cst_121 = arith.constant dense<0.000000e+00> : vector<1x16xf32>
    %192 = tpu.matmul %189, %191, %cst_121 {dimension_numbers = #tpu.dot_dimension_numbers<[1], [0], [0], [1], [0, 0, 1, 1], [], []>} : vector<1x128xf32>, vector<128x16xf32>, vector<1x16xf32> -> vector<1x16xf32>
    %193 = arith.addf %188, %192 : vector<1x16xf32>
    %194 = vector.extract_strided_slice %184 {offsets = [2, 0], sizes = [1, 128], strides = [1, 1]} : vector<4x128xf32> to vector<1x128xf32>
    %c2_122 = arith.constant 2 : index
    %c0_123 = arith.constant 0 : index
    %c0_124 = arith.constant 0 : index
    %195 = vector.load %arg8[%c2_122, %c0_123, %c0_124] : memref<4x128x16xf32, #tpu.memory_space<vmem>>, vector<1x128x16xf32>
    %196 = vector.shape_cast %195 : vector<1x128x16xf32> to vector<128x16xf32>
    %cst_125 = arith.constant dense<0.000000e+00> : vector<1x16xf32>
    %197 = tpu.matmul %194, %196, %cst_125 {dimension_numbers = #tpu.dot_dimension_numbers<[1], [0], [0], [1], [0, 0, 1, 1], [], []>} : vector<1x128xf32>, vector<128x16xf32>, vector<1x16xf32> -> vector<1x16xf32>
    %198 = arith.addf %193, %197 : vector<1x16xf32>
    %199 = vector.extract_strided_slice %184 {offsets = [3, 0], sizes = [1, 128], strides = [1, 1]} : vector<4x128xf32> to vector<1x128xf32>
    %c3_126 = arith.constant 3 : index
    %c0_127 = arith.constant 0 : index
    %c0_128 = arith.constant 0 : index
    %200 = vector.load %arg8[%c3_126, %c0_127, %c0_128] : memref<4x128x16xf32, #tpu.memory_space<vmem>>, vector<1x128x16xf32>
    %201 = vector.shape_cast %200 : vector<1x128x16xf32> to vector<128x16xf32>
    %cst_129 = arith.constant dense<0.000000e+00> : vector<1x16xf32>
    %202 = tpu.matmul %199, %201, %cst_129 {dimension_numbers = #tpu.dot_dimension_numbers<[1], [0], [0], [1], [0, 0, 1, 1], [], []>} : vector<1x128xf32>, vector<128x16xf32>, vector<1x16xf32> -> vector<1x16xf32>
    %203 = arith.addf %198, %202 : vector<1x16xf32>
    %c0_130 = arith.constant 0 : index
    %c0_131 = arith.constant 0 : index
    %204 = vector.load %arg9[%c0_130, %c0_131] : memref<1x16xf32, #tpu.memory_space<vmem>>, vector<1x16xf32>
    %205 = arith.addf %203, %204 : vector<1x16xf32>
    %206 = vector.shape_cast %205 : vector<1x16xf32> to vector<1x1x16xf32>
    %c0_132 = arith.constant 0 : index
    %c0_133 = arith.constant 0 : index
    %c0_134 = arith.constant 0 : index
    %207 = vector.load %arg10[%c0_132, %c0_133, %c0_134] : memref<1x1x16xf32, #tpu.memory_space<vmem>>, vector<1x1x16xf32>
    tpu.vector_store %arg10[%c0_132, %c0_133, %c0_134], %206 {strides = array<i32>} : memref<1x1x16xf32, #tpu.memory_space<vmem>>, vector<1x1x16xf32>,
    return
  }
  func.func @transform_0(%arg0: i32) -> (i32, i32, i32) {
    %c0_i32 = arith.constant 0 : i32
    %c0_i32_0 = arith.constant 0 : i32
    %c0_i32_1 = arith.constant 0 : i32
    return %arg0, %c0_i32, %c0_i32_0 : i32, i32, i32
  }
  func.func @transform_1(%arg0: i32) -> (i32, i32, i32) {
    %c0_i32 = arith.constant 0 : i32
    %c0_i32_0 = arith.constant 0 : i32
    %c0_i32_1 = arith.constant 0 : i32
    %c0_i32_2 = arith.constant 0 : i32
    return %c0_i32, %c0_i32_0, %c0_i32_1 : i32, i32, i32
  }
  func.func @transform_2(%arg0: i32) -> (i32, i32) {
    %c0_i32 = arith.constant 0 : i32
    %c0_i32_0 = arith.constant 0 : i32
    %c0_i32_1 = arith.constant 0 : i32
    return %c0_i32, %c0_i32_0 : i32, i32
  }
  func.func @transform_3(%arg0: i32) -> (i32, i32, i32) {
    %c0_i32 = arith.constant 0 : i32
    %c0_i32_0 = arith.constant 0 : i32
    %c0_i32_1 = arith.constant 0 : i32
    %c0_i32_2 = arith.constant 0 : i32
    return %c0_i32, %c0_i32_0, %c0_i32_1 : i32, i32, i32
  }
  func.func @transform_4(%arg0: i32) -> (i32, i32) {
    %c0_i32 = arith.constant 0 : i32
    %c0_i32_0 = arith.constant 0 : i32
    %c0_i32_1 = arith.constant 0 : i32
    return %c0_i32, %c0_i32_0 : i32, i32
  }
  func.func @transform_5(%arg0: i32) -> (i32, i32, i32) {
    %c0_i32 = arith.constant 0 : i32
    %c0_i32_0 = arith.constant 0 : i32
    %c0_i32_1 = arith.constant 0 : i32
    %c0_i32_2 = arith.constant 0 : i32
    return %c0_i32, %c0_i32_0, %c0_i32_1 : i32, i32, i32
  }
  func.func @transform_6(%arg0: i32) -> (i32, i32) {
    %c0_i32 = arith.constant 0 : i32
    %c0_i32_0 = arith.constant 0 : i32
    %c0_i32_1 = arith.constant 0 : i32
    return %c0_i32, %c0_i32_0 : i32, i32
  }
  func.func @transform_7(%arg0: i32) -> (i32, i32, i32) {
    %c0_i32 = arith.constant 0 : i32
    %c0_i32_0 = arith.constant 0 : i32
    %c0_i32_1 = arith.constant 0 : i32
    %c0_i32_2 = arith.constant 0 : i32
    return %c0_i32, %c0_i32_0, %c0_i32_1 : i32, i32, i32
  }
  func.func @transform_8(%arg0: i32) -> (i32, i32) {
    %c0_i32 = arith.constant 0 : i32
    %c0_i32_0 = arith.constant 0 : i32
    %c0_i32_1 = arith.constant 0 : i32
    return %c0_i32, %c0_i32_0 : i32, i32
  }
  func.func @transform_9(%arg0: i32) -> (i32, i32, i32) {
    %c0_i32 = arith.constant 0 : i32
    %c0_i32_0 = arith.constant 0 : i32
    %c0_i32_1 = arith.constant 0 : i32
    return %arg0, %c0_i32, %c0_i32_0 : i32, i32, i32
  }
}

</mosaic_0001>

<bundles_post_ra>
// kernel: tile.20
= control target key start
LH: loop header
LB: loop body
LE: loop exit
PB: predicated region body
PF: predicated region fallthrough
CT: control target
= control target key end

     0   :  { %s133_s10 = smov 60   ;;  %s134_s11 = smov 52   ;;  %vm3_vm0 = vcmask 31744   ;;  %vm9_vm1 = vcmask 523744   ;;  %vm15_vm2 = vcmask 490944   ;;  %vm21_vm3 = vcmask 458144   ;;  %s209_s0 = inlined_call_operand.vmem [shape: f32[16,4], index: 0, kind: input, shape index: {}]   ;;  %s210_s1 = inlined_call_operand.vmem [shape: f32[1,64], index: 1, kind: output, shape index: {}]  }
   0x1   :  { %v103_v0 = vld [vmem:[%s209_s0 + $0xf] sm:$0x1]   ;;  %v105_v1 = vld [vmem:[%s209_s0 + $0xd] sm:$0x1]   ;;  %v104_v2 = vld [vmem:[%s209_s0 + $0xe] sm:$0x1]  }
   0x2   :  { %7 = vrot.lane.b32.xlu0 %v103_v0, %s133_s10  ;;  %19 = vrot.lane.b32.xlu1 %v105_v1, %s134_s11  ;;  %v106_v3 = vld [vmem:[%s209_s0 + $0xc] sm:$0x1]   ;;  %s135_s16 = smov 56   ;;  %s136_s17 = smov 48   ;;  %v107_v4 = vld [vmem:[%s209_s0 + $0xb] sm:$0x1]  }
   0x3   :  { %v108_v5 = vld [vmem:[%s209_s0 + $0xa] sm:$0x1]   ;;  %v2_v6 = vld [vmem:[%s209_s0] sm:$0x1]   ;;  %s137_s24 = smov 44   ;;  %s138_s25 = smov 40  }
   0x4   :  { %4 = vst.msk [vmem:[#allocation0] sm:$0x1] %vm3_vm0, %v2_v6   ;;  %v109_v7 = vld [vmem:[%s209_s0 + $0x9] sm:$0x1]   ;;  %v110_v8 = vld [vmem:[%s209_s0 + $0x8] sm:$0x1]  }
   0x5   :  { %s139_s30 = smov 36   ;;  %s140_s2 = smov 32   ;;  %v111_v9 = vld [vmem:[%s209_s0 + $0x7] sm:$0x1]   ;;  %v112_v10 = vld [vmem:[%s209_s0 + $0x6] sm:$0x1]  }
   0x6   :  { %13 = vrot.lane.b32.xlu0 %v104_v2, %s135_s16  ;;  %25 = vrot.lane.b32.xlu1 %v106_v3, %s136_s17  ;;  %s141_s7 = smov 28   ;;  %s142_s8 = smov 24   ;;  %v113_v11 = vld [vmem:[%s209_s0 + $0x5] sm:$0x1]   ;;  %v114_v12 = vld [vmem:[%s209_s0 + $0x4] sm:$0x1]  }
   0x7   :  { %s143_s13 = smov 20   ;;  %s144_s14 = smov 16   ;;  %v115_v13 = vld [vmem:[%s209_s0 + $0x3] sm:$0x1]   ;;  %v116_v14 = vld [vmem:[%s209_s0 + $0x2] sm:$0x1]  }
   0x8   :  { %s145_s19 = smov 12   ;;  %s146_s20 = smov 8   ;;  %v117_v15 = vld [vmem:[%s209_s0 + $0x1] sm:$0x1]   ;;  %vm27_vm4 = vcmask 425344   ;;  %vm33_vm5 = vcmask 392544  }
   0x9   :  { %s147_s0 = smov 4   ;;  %vm39_vm6 = vcmask 359744   ;;  %vm45_vm7 = vcmask 326944   ;;  %vm51_vm8 = vcmask 294144   ;;  %vm57_vm9 = vcmask 261344  }
   0xa   :  { %31 = vrot.lane.b32.xlu0 %v107_v4, %s137_s24  ;;  %37 = vrot.lane.b32.xlu1 %v108_v5, %s138_s25  ;;  %vm63_vm10 = vcmask 228544   ;;  %vm69_vm11 = vcmask 195744   ;;  %vm75_vm12 = vcmask 162944   ;;  %vm81_vm13 = vcmask 130144  }
   0xb   :  { %vm87_vm14 = vcmask 97344   ;;  %vm93_vm15 = vcmask 64544  }
   0xe   :  { %43 = vrot.lane.b32.xlu0 %v109_v7, %s139_s30  ;;  %49 = vrot.lane.b32.xlu1 %v110_v8, %s140_s2 }
  0x12   :  { %55 = vrot.lane.b32.xlu0 %v111_v9, %s141_s7  ;;  %61 = vrot.lane.b32.xlu1 %v112_v10, %s142_s8 }
  0x16   :  { %67 = vrot.lane.b32.xlu0 %v113_v11, %s143_s13  ;;  %73 = vrot.lane.b32.xlu1 %v114_v12, %s144_s14 }
  0x1a   :  { %79 = vrot.lane.b32.xlu0 %v115_v13, %s145_s19  ;;  %85 = vrot.lane.b32.xlu1 %v116_v14, %s146_s20 }
  0x1e   :  { %91 = vrot.lane.b32.xlu0 %v117_v15, %s147_s0 }
  0x74   :  { %v8_v16 = vpop.permute.xlu0 %7   ;;  %v20_v17 = vpop.permute.xlu1 %19  }
  0x75   :  { %10 = vst.msk [vmem:[#allocation0] sm:$0x1] %vm9_vm1, %v8_v16  }
  0x78   :  { %v14_v18 = vpop.permute.xlu0 %13   ;;  %v26_v19 = vpop.permute.xlu1 %25  }
  0x79   :  { %16 = vst.msk [vmem:[#allocation0] sm:$0x1] %vm15_vm2, %v14_v18  }
  0x7a   :  { %22 = vst.msk [vmem:[#allocation0] sm:$0x1] %vm21_vm3, %v20_v17  }
  0x7b   :  { %28 = vst.msk [vmem:[#allocation0] sm:$0x1] %vm27_vm4, %v26_v19  }
  0x7c   :  { %v32_v20 = vpop.permute.xlu0 %31   ;;  %v38_v21 = vpop.permute.xlu1 %37  }
  0x7d   :  { %34 = vst.msk [vmem:[#allocation0] sm:$0x1] %vm33_vm5, %v32_v20  }
  0x7e   :  { %40 = vst.msk [vmem:[#allocation0] sm:$0x1] %vm39_vm6, %v38_v21  }
  0x80   :  { %v44_v22 = vpop.permute.xlu0 %43   ;;  %v50_v23 = vpop.permute.xlu1 %49  }
  0x81   :  { %46 = vst.msk [vmem:[#allocation0] sm:$0x1] %vm45_vm7, %v44_v22  }
  0x82   :  { %52 = vst.msk [vmem:[#allocation0] sm:$0x1] %vm51_vm8, %v50_v23  }
  0x84   :  { %v56_v24 = vpop.permute.xlu0 %55   ;;  %v62_v25 = vpop.permute.xlu1 %61  }
  0x85   :  { %58 = vst.msk [vmem:[#allocation0] sm:$0x1] %vm57_vm9, %v56_v24  }
  0x86   :  { %64 = vst.msk [vmem:[#allocation0] sm:$0x1] %vm63_vm10, %v62_v25  }
  0x88   :  { %v68_v26 = vpop.permute.xlu0 %67   ;;  %v74_v27 = vpop.permute.xlu1 %73  }
  0x89   :  { %70 = vst.msk [vmem:[#allocation0] sm:$0x1] %vm69_vm11, %v68_v26  }
  0x8a   :  { %76 = vst.msk [vmem:[#allocation0] sm:$0x1] %vm75_vm12, %v74_v27  }
  0x8c   :  { %v80_v28 = vpop.permute.xlu0 %79   ;;  %v86_v29 = vpop.permute.xlu1 %85  }
  0x8d   :  { %82 = vst.msk [vmem:[#allocation0] sm:$0x1] %vm81_vm13, %v80_v28  }
  0x8e   :  { %88 = vst.msk [vmem:[#allocation0] sm:$0x1] %vm87_vm14, %v86_v29  }
  0x90   :  { %v92_v30 = vpop.permute.xlu0 %91  }
  0x91   :  { %94 = vst.msk [vmem:[#allocation0] sm:$0x1] %vm93_vm15, %v92_v30  }
  0x98   :  { %v99_v31 = vld [vmem:[#allocation0] sm:$0x1] }
  0x99   :  { %102 = vst [vmem:[%s210_s1] sm:$0x1] %v99_v31 }

// kernel: tile.19
= control target key start
LH: loop header
LB: loop body
LE: loop exit
PB: predicated region body
PF: predicated region fallthrough
CT: control target
= control target key end

     0   :  { %s28_s0 = inlined_call_operand.vmem [shape: f32[4], index: 0, kind: input, shape index: {}]   ;;  %s29_s1 = inlined_call_operand.vmem [shape: f32[16,4], index: 1, kind: output, shape index: {}]  }
   0x1   :  { %v4_v0 = vld [vmem:[%s28_s0] ss:$0 sm:$0xff] }
   0x2   :  { %5 = vst [vmem:[%s29_s1] sm:$0xff] %v4_v0  ;;  %8 = vst [vmem:[%s29_s1 + $0x8] sm:$0xff] %v4_v0 }

// kernel: tile.24
= control target key start
LH: loop header
LB: loop body
LE: loop exit
PB: predicated region body
PF: predicated region fallthrough
CT: control target
= control target key end

     0   :  { %s22_s0 = inlined_call_operand.vmem [shape: f32[16], index: 0, kind: input, shape index: {}]   ;;  %s23_s1 = inlined_call_operand.vmem [shape: f32[8,16], index: 1, kind: output, shape index: {}]  }
   0x1   :  { %v4_v0 = vld [vmem:[%s22_s0] ss:$0 sm:$0xff] }
   0x2   :  { %5 = vst [vmem:[%s23_s1] sm:$0xff] %v4_v0 }

// kernel: tile.25
= control target key start
LH: loop header
LB: loop body
LE: loop exit
PB: predicated region body
PF: predicated region fallthrough
CT: control target
= control target key end

     0   :  { %s69_s10 = smov 112   ;;  %s70_s11 = smov 80   ;;  %vm3_vm0 = vcmask 130048   ;;  %vm9_vm1 = vcmask 1048448   ;;  %vm15_vm2 = vcmask 917248   ;;  %vm21_vm3 = vcmask 786048   ;;  %s113_s0 = inlined_call_operand.vmem [shape: f32[8,16], index: 0, kind: input, shape index: {}]   ;;  %s114_s1 = inlined_call_operand.vmem [shape: f32[1,128], index: 1, kind: output, shape index: {}]  }
   0x1   :  { %v55_v0 = vld [vmem:[%s113_s0 + $0x7] sm:$0x1]   ;;  %v57_v1 = vld [vmem:[%s113_s0 + $0x5] sm:$0x1]   ;;  %v56_v2 = vld [vmem:[%s113_s0 + $0x6] sm:$0x1]  }
   0x2   :  { %7 = vrot.lane.b32.xlu0 %v55_v0, %s69_s10  ;;  %19 = vrot.lane.b32.xlu1 %v57_v1, %s70_s11  ;;  %v58_v3 = vld [vmem:[%s113_s0 + $0x4] sm:$0x1]   ;;  %v2_v4 = vld [vmem:[%s113_s0] sm:$0x1]   ;;  %s71_s18 = smov 96   ;;  %s72_s19 = smov 64  }
   0x3   :  { %4 = vst.msk [vmem:[#allocation0] sm:$0x1] %vm3_vm0, %v2_v4   ;;  %v59_v5 = vld [vmem:[%s113_s0 + $0x3] sm:$0x1]   ;;  %v60_v6 = vld [vmem:[%s113_s0 + $0x2] sm:$0x1]  }
   0x4   :  { %s73_s24 = smov 48   ;;  %s74_s25 = smov 32   ;;  %v61_v7 = vld [vmem:[%s113_s0 + $0x1] sm:$0x1]   ;;  %vm27_vm4 = vcmask 654848   ;;  %vm33_vm5 = vcmask 523648  }
   0x5   :  { %s75_s0 = smov 16   ;;  %vm39_vm6 = vcmask 392448   ;;  %vm45_vm7 = vcmask 261248  }
   0x6   :  { %13 = vrot.lane.b32.xlu0 %v56_v2, %s71_s18  ;;  %25 = vrot.lane.b32.xlu1 %v58_v3, %s72_s19 }
   0xa   :  { %31 = vrot.lane.b32.xlu0 %v59_v5, %s73_s24  ;;  %37 = vrot.lane.b32.xlu1 %v60_v6, %s74_s25 }
   0xe   :  { %43 = vrot.lane.b32.xlu0 %v61_v7, %s75_s0 }
  0x74   :  { %v8_v8 = vpop.permute.xlu0 %7   ;;  %v20_v9 = vpop.permute.xlu1 %19  }
  0x75   :  { %10 = vst.msk [vmem:[#allocation0] sm:$0x1] %vm9_vm1, %v8_v8  }
  0x78   :  { %v14_v10 = vpop.permute.xlu0 %13   ;;  %v26_v11 = vpop.permute.xlu1 %25  }
  0x79   :  { %16 = vst.msk [vmem:[#allocation0] sm:$0x1] %vm15_vm2, %v14_v10  }
  0x7a   :  { %22 = vst.msk [vmem:[#allocation0] sm:$0x1] %vm21_vm3, %v20_v9  }
  0x7b   :  { %28 = vst.msk [vmem:[#allocation0] sm:$0x1] %vm27_vm4, %v26_v11  }
  0x7c   :  { %v32_v12 = vpop.permute.xlu0 %31   ;;  %v38_v13 = vpop.permute.xlu1 %37  }
  0x7d   :  { %34 = vst.msk [vmem:[#allocation0] sm:$0x1] %vm33_vm5, %v32_v12  }
  0x7e   :  { %40 = vst.msk [vmem:[#allocation0] sm:$0x1] %vm39_vm6, %v38_v13  }
  0x80   :  { %v44_v14 = vpop.permute.xlu0 %43  }
  0x81   :  { %46 = vst.msk [vmem:[#allocation0] sm:$0x1] %vm45_vm7, %v44_v14  }
  0x88   :  { %v51_v15 = vld [vmem:[#allocation0] sm:$0x1] }
  0x89   :  { %54 = vst [vmem:[%s114_s1] sm:$0x1] %v51_v15 }

// kernel: tile.29
= control target key start
LH: loop header
LB: loop body
LE: loop exit
PB: predicated region body
PF: predicated region fallthrough
CT: control target
= control target key end

     0   :  { %s22_s0 = inlined_call_operand.vmem [shape: f32[32], index: 0, kind: input, shape index: {}]   ;;  %s23_s1 = inlined_call_operand.vmem [shape: f32[4,32], index: 1, kind: output, shape index: {}]  }
   0x1   :  { %v4_v0 = vld [vmem:[%s22_s0] ss:$0 sm:$0xff] }
   0x2   :  { %5 = vst [vmem:[%s23_s1] sm:$0xf] %v4_v0 }

// kernel: tile.30
= control target key start
LH: loop header
LB: loop body
LE: loop exit
PB: predicated region body
PF: predicated region fallthrough
CT: control target
= control target key end

     0   :  { %vm8_vm0 = vcmask 261120   ;;  %s40_s8 = smov 32   ;;  %s41_s9 = smov 64   ;;  %vm14_vm1 = vcmask 1048320   ;;  %vm20_vm2 = vcmask 785920   ;;  %vm26_vm3 = vcmask 523520   ;;  %s58_s0 = inlined_call_operand.vmem [shape: f32[4,32], index: 0, kind: input, shape index: {}]   ;;  %s59_s1 = inlined_call_operand.vmem [shape: f32[1,128], index: 1, kind: output, shape index: {}]  }
   0x1   :  { %v5_v0 = vld [vmem:[%s58_s0] sm:$0xf]  ;;  %s39_s0 = smov 96  }
   0x2   :  { %6 = vst [vmem:[#allocation1] sm:$0xf] %v5_v0 }
   0x9   :  { %v11_v1 = vld [vmem:[#allocation1 + $0x3] sm:$0x1]   ;;  %v23_v2 = vld [vmem:[#allocation1 + $0x1] sm:$0x1]   ;;  %v7_v3 = vld [vmem:[#allocation1] sm:$0x1]  }
   0xa   :  { %12 = vrot.lane.b32.xlu0 %v11_v1, %s39_s0  ;;  %24 = vrot.lane.b32.xlu1 %v23_v2, %s40_s8  ;;  %v17_v4 = vld [vmem:[#allocation1 + $0x2] sm:$0x1]   ;;  %9 = vst.msk [vmem:[#allocation0] sm:$0x1] %vm8_vm0, %v7_v3  }
   0xe   :  { %18 = vrot.lane.b32.xlu0 %v17_v4, %s41_s9 }
  0x7c   :  { %v13_v5 = vpop.permute.xlu0 %12   ;;  %v25_v6 = vpop.permute.xlu1 %24  }
  0x7d   :  { %15 = vst.msk [vmem:[#allocation0] sm:$0x1] %vm14_vm1, %v13_v5  }
  0x80   :  { %v19_v7 = vpop.permute.xlu0 %18  }
  0x81   :  { %21 = vst.msk [vmem:[#allocation0] sm:$0x1] %vm20_vm2, %v19_v7  }
  0x82   :  { %27 = vst.msk [vmem:[#allocation0] sm:$0x1] %vm26_vm3, %v25_v6  }
  0x89   :  { %v32_v8 = vld [vmem:[#allocation0] sm:$0x1] }
  0x8a   :  { %35 = vst [vmem:[%s59_s1] sm:$0x1] %v32_v8 }

// kernel: encoder_forward.1
= control target key start
LH: loop header
LB: loop body
LE: loop exit
PB: predicated region body
PF: predicated region fallthrough
CT: control target
= control target key end

     0   :  { %14 = vsyncpa [#allocation3], 0  ;;  %s4802_s0 = inlined_call_operand.vmem [shape: f32[2,32,32], index: 0, kind: input, shape index: {}]   ;;  %s4803_s1 = inlined_call_operand.vmem [shape: f32[4,32,64], index: 1, kind: input, shape index: {}]   ;;  %s4804_s2 = inlined_call_operand.vmem [shape: f32[1,64], index: 2, kind: input, shape index: {}]   ;;  %s4805_s3 = inlined_call_operand.vmem [shape: f32[4,64,128], index: 3, kind: input, shape index: {}]   ;;  %s4806_s4 = inlined_call_operand.vmem [shape: f32[1,128], index: 4, kind: input, shape index: {}]   ;;  %s4807_s5 = inlined_call_operand.vmem [shape: f32[4,128,128], index: 5, kind: input, shape index: {}]   ;;  %s4808_s6 = inlined_call_operand.vmem [shape: f32[1,128], index: 6, kind: input, shape index: {}]   ;;  %s4809_s7 = inlined_call_operand.vmem [shape: f32[4,128,16], index: 7, kind: input, shape index: {}]   ;;  %s4810_s8 = inlined_call_operand.vmem [shape: f32[1,16], index: 8, kind: input, shape index: {}]   ;;  %s4811_s9 = inlined_call_operand.hbm [shape: f32[2,1,16], index: 9, kind: output, shape index: {}]  }
   0x1   :  { %16 = vsyncpa [#allocation3 + $0x1], 0  ;;  %s3818_s30 = smov 0   ;;  %s3820_s10 = smov 0  }
   0x2   :  { %s3822_s11 = smov 0   ;;  %s3824_s12 = smov 0  }
   0x3 LB: > { %s3839_s13 = sadd.s32 4294967295, %s3763_s12   ;;  %s2757_s14 = sadd.s32 4294967294, %s3763_s12   ;;  %s3763_s12 = sphi %s3824_s12, %s4817_s12   ;;  %s3759_s11 = sphi %s3822_s11, %s4816_s11   ;;  %s3755_s10 = sphi %s3820_s10, %s4815_s10   ;;  %s3751_s30 = sphi %s3818_s30, %s4814_s30  }
   0x4   : > { %s3843_s15 = sadd.s32 1, %s3763_s12   ;;  %s223_s16 = sadd.s32 1, %s3759_s11 }
   0x5   : > { %s220_s17 = ssub.s32 %s3763_s12, %s3843_s15  ;;  %p233_p0 = scmp.ne.s32.totalorder %s3759_s11, %s3755_s10 }
   0x6   : > { %p221_p1 = scmp.eq.s32.totalorder %s220_s17, 0  ;;  %p234_p2 = scmp.eq.s32.totalorder %s3839_s13, 1 }
   0x7   : > { %p239_p3 = scmp.ne.s32.totalorder %s3755_s10, %s3751_s30  ;;  %p240_p4 = scmp.eq.s32.totalorder %s2757_s14, 1 }
   0x8   : > { %s3854_s18 = scalar_select %p221_p1, %s3759_s11, %s223_s16  }
   0x9   : > { %p3856_p5 = por %p234_p2, %p233_p0  ;;  %p3860_p6 = por %p240_p4, %p239_p3 }
   0xa   : > { %p2760_p7 = scmp.ge.s32.totalorder %s3763_s12, 1  ;;  %p290_p8 = scmp.lt.s32.totalorder %s3763_s12, 3 }
   0xc   : > { %p291_p9 = pnand %p2760_p7, %p290_p8 }
   0xd   : > { %p325_p10 = scmp.lt.s32.totalorder (!%p291_p9), %s3839_s13, 1  ;;  %s323_s24 = sand.u32 (!%p291_p9), 1, %s3755_s10  }
   0xe   : > { %294 = sbr.rel (%p291_p9) target bundleno = 2087 (0x827), region = 56  ;;  %s2926_s27 = sshll.u32 (!%p291_p9), %s3839_s13, 4 }
   0xf   : > { %s324_s28 = scalar_lea.vmem (!%p291_p9), [#allocation2], %s323_s24  ;;  %s2700_s17 = scalar_lea.hbm (!%p291_p9), %s4811_s9, %s2926_s27 }
  0x10   : > { %s2702_s29 = sshll.u32 (!%p291_p9), %s324_s28, 4  ;;  %s3767_s23 = smov (!%p291_p9), [#allocation2]   ;;  %s2703_s29 = int_to_ptr.vmem [resolvable:$true] %s2702_s29 }
  0x13   : > { %v334_v0 = vlaneseq  ;;  %s326_s21 = scalar_select %p325_p10, %s3839_s13, 1  ;;  %v3765_v12 = vmov 0.0   ;;  %vm347_vm4 = vcmask 261120   ;;  %v2770_v17 = vld [vmem:[%s4803_s1 + $0x38] sm:$0xff]  ;;  %v2769_v19 = vld [vmem:[%s4803_s1 + $0x30] sm:$0xff]  ;;  %v2768_v21 = vld [vmem:[%s4803_s1 + $0x28] sm:$0xff] }
  0x14   : > { %v432_v18 = vld [vmem:[%s4803_s1 + $0x18] sm:$0xff]  ;;  %v431_v20 = vld [vmem:[%s4803_s1 + $0x10] sm:$0xff]  ;;  %v430_v22 = vld [vmem:[%s4803_s1 + $0x8] sm:$0xff]  ;;  %vm3766_vm9 = vmmov 0   ;;  %vm1050_vm12 = vcmask 130048   ;;  %vm1212_vm13 = vcmask 523264  }
  0x15   : > { %v335_v1 = vshrl.u32 %v334_v0, 7  ;;  %s2929_s22 = sshll.u32 %s326_s21, 5  ;;  %v3868_v2 = vand.u32 127, %v334_v0  ;;  %v2767_v23 = vld [vmem:[%s4803_s1 + $0x20] sm:$0xff]  ;;  %v2780_v37 = vld [vmem:[%s4803_s1 + $0x58] sm:$0xff]  ;;  %v2779_v38 = vld [vmem:[%s4803_s1 + $0x50] sm:$0xff] }
  0x16   : > { %s329_s25 = scalar_lea.vmem %s4802_s0, %s2929_s22  ;;  %v429_v24 = vld [vmem:[%s4803_s1] sm:$0xff]  ;;  %v2778_v39 = vld [vmem:[%s4803_s1 + $0x48] sm:$0xff]  ;;  %v2788_v41 = vld [vmem:[%s4803_s1 + $0x78] sm:$0xff]  ;;  %vm1680_vm15 = vcmask 64512   ;;  %s2690_s21 = scalar_lea.sflag [#allocation3], %s323_s24 }
  0x17   : > { %v3870_v3 = vmul.u32 2, %v335_v1  ;;  %v336_v4 = vadd.s32 8, %v335_v1  ;;  %v3875_v5 = vld [vmem:[%s329_s25 + $0x18] sm:$0xff]  ;;  %v3877_v6 = vld [vmem:[%s329_s25 + $0x10] sm:$0xff]  ;;  %v3886_v9 = vld [vmem:[%s329_s25 + $0x8] sm:$0xff]  ;;  %s3703_s22 = scalar_lea.vmem %s2703_s29, 16 }
  0x18   : > { %3170 = vmatprep.subr.mxu0 %v3875_v5  ;;  %3181 = vmatprep.subr.mxu1 %v3875_v5  ;;  %v3896_v11 = vld [vmem:[%s329_s25] sm:$0xff]  ;;  %v2787_v46 = vld [vmem:[%s4803_s1 + $0x70] sm:$0xff]  ;;  %v2786_v47 = vld [vmem:[%s4803_s1 + $0x68] sm:$0xff]  ;;  %p3704_p11 = scmp.ne.s32.totalorder %s2703_s29, %s3703_s22  ;;  %s3707_s25 = sshll.u32 %s3767_s23, 4  ;;  %s3708_s25 = int_to_ptr.vmem [resolvable:$false] %s3707_s25 }
  0x19   : > { %v341_v7 = vadd.s32 4294967295, %v3870_v3  ;;  %v3880_v8 = vmul.u32 2, %v336_v4  ;;  %3171 = vmatpush3.msra.mxu0 %v3875_v5  ;;  %3182 = vmatpush3.msra.mxu1 %v3875_v5  ;;  %vm433_vm1 = vcmp.eq.s32.totalorder %v3868_v2, %v3870_v3  ;;  %v685_v25 = vadd.s32 1, %v3870_v3  ;;  %v2777_v40 = vld [vmem:[%s4803_s1 + $0x40] sm:$0xff]  ;;  %v2801_v51 = vld [vmem:[%s4805_s3 + $0x78] sm:$0xff]  ;;  %v2800_v52 = vld [vmem:[%s4805_s3 + $0x70] sm:$0xff]  ;;  %p3710_p0 = scmp.lt.s32.totalorder %s2703_s29, %s3708_s25 }
  0x1a   : > { %3172 = vmatprep.subr.mxu0 %v3877_v6  ;;  %3183 = vmatprep.subr.mxu1 %v3877_v6  ;;  %v3909_v14 = vsel %vm433_vm1, 1.0, %v3765_v12  ;;  %v860_v32 = vadd.s32 2, %v3870_v3  ;;  %v2785_v48 = vld [vmem:[%s4803_s1 + $0x60] sm:$0xff]  ;;  %v2799_v53 = vld [vmem:[%s4805_s3 + $0x68] sm:$0xff]  ;;  %v2797_v55 = vld [vmem:[%s4805_s3 + $0x58] sm:$0xff]  ;;  %vm2687_vm1 = vcmask 122880   ;;  %p3705_p12 = pnand %p3704_p11, %p3856_p5 }
  0x1b   : > { %vm343_vm0 = vcmp.eq.s32.totalorder %v3868_v2, %v341_v7  ;;  %v342_v10 = vadd.s32 4294967295, %v3880_v8  ;;  %3173 = vmatpush3.msra.mxu0 %v3877_v6  ;;  %3184 = vmatpush3.msra.mxu1 %v3877_v6  ;;  %vm434_vm3 = vcmp.eq.s32.totalorder %v3868_v2, %v3880_v8  ;;  %vm687_vm5 = vcmp.eq.s32.totalorder %v3868_v2, %v685_v25  ;;  %v2798_v54 = vld [vmem:[%s4805_s3 + $0x60] sm:$0xff]  ;;  %v2796_v56 = vld [vmem:[%s4805_s3 + $0x50] sm:$0xff]  ;;  %v2812_v25 = vld [vmem:[%s4805_s3 + $0xb8] sm:$0xff]  ;;  %s3709_s13 = scalar_lea.vmem %s3708_s25, 32 }
  0x1c   : > { %3174 = vmatprep.subr.mxu0 %v3886_v9  ;;  %3185 = vmatprep.subr.mxu1 %v3886_v9  ;;  %v3904_v13 = vsel %vm343_vm0, 1.0, %v3765_v12  ;;  %v436_v16 = vsel %vm434_vm3, 1.0, %v3765_v12  ;;  %v3951_v30 = vsel %vm687_vm5, 1.0, %v3765_v12  ;;  %v686_v31 = vadd.s32 1, %v3880_v8  ;;  %v2791_v1 = vld [vmem:[%s4804_s2] ss:$0 sm:$0xff]  ;;  %p3706_p13 = pneg %p3705_p12  ;;  %p3711_p1 = scmp.lt.s32.totalorder %s3709_s13, %s3703_s22 }
  0x1d   : > { %vm344_vm2 = vcmp.eq.s32.totalorder %v3868_v2, %v342_v10  ;;  %3175 = vmatpush3.msra.mxu0 %v3886_v9  ;;  %3186 = vmatpush3.msra.mxu1 %v3886_v9  ;;  %vm862_vm7 = vcmp.eq.s32.totalorder %v3868_v2, %v860_v32  ;;  %v861_v35 = vadd.s32 2, %v3880_v8 }
  0x1e   : > { %3176 = vmatprep.subr.mxu0 %v3896_v11  ;;  %3187 = vmatprep.subr.mxu1 %v3896_v11  ;;  %v346_v15 = vsel %vm344_vm2, 1.0, %v3765_v12  ;;  %vm688_vm6 = vcmp.eq.s32.totalorder %v3868_v2, %v686_v31  ;;  %v3971_v34 = vsel %vm862_vm7, 1.0, %v3765_v12  ;;  %v2810_v31 = vld [vmem:[%s4805_s3 + $0xa8] sm:$0xff]  ;;  %p3712_p2 = por %p3711_p1, %p3710_p0 }
  0x1f   : > { %3177 = vmatpush3.msra.mxu0 %v3896_v11  ;;  %3178 = vmatprep.mubr.msk.f32.mxu0 %vm347_vm4, %v3904_v13  ;;  %v690_v33 = vsel %vm688_vm6, 1.0, %v3765_v12  ;;  %vm863_vm8 = vcmp.eq.s32.totalorder %v3868_v2, %v861_v35  ;;  %v2809_v35 = vld [vmem:[%s4805_s3 + $0xa0] sm:$0xff] }
  0x20   : > { %3188 = vmatpush3.msra.mxu1 %v3896_v11  ;;  %3189 = vmatprep.mubr.msk.f32.mxu1 %vm347_vm4, %v3909_v14  ;;  %v865_v36 = vsel %vm863_vm8, 1.0, %v3765_v12  ;;  %p3713_p3 = pnand %p3712_p2, %p3706_p13 }
  0x21   : > { %3179 = vmatmul.mubr.msk.f32.vlgmr.msra.gmra.mxu0 %vm347_vm4, %v346_v15  ;;  %3190 = vmatmul.mubr.msk.f32.vlgmr.msra.gmra.mxu1 %vm347_vm4, %v436_v16  ;;  %v1130_v15 = vld [vmem:[%s4805_s3 + $0x38] sm:$0xff]  ;;  %v1129_v16 = vld [vmem:[%s4805_s3 + $0x30] sm:$0xff] }
  0x22   : > { %3192 = vmatprep.subr.mxu0 %v2770_v17  ;;  %3203 = vmatprep.subr.mxu1 %v432_v18 }
  0x23   : > { %3193 = vmatpush3.msra.mxu0 %v2770_v17  ;;  %3204 = vmatpush3.msra.mxu1 %v432_v18  ;;  %v1128_v17 = vld [vmem:[%s4805_s3 + $0x28] sm:$0xff]  ;;  %v1127_v18 = vld [vmem:[%s4805_s3 + $0x20] sm:$0xff] }
  0x24   : > { %3194 = vmatprep.subr.mxu0 %v2769_v19  ;;  %3205 = vmatprep.subr.mxu1 %v431_v20 }
  0x25   : > { %3195 = vmatpush3.msra.mxu0 %v2769_v19  ;;  %3206 = vmatpush3.msra.mxu1 %v431_v20  ;;  %v1126_v19 = vld [vmem:[%s4805_s3 + $0x18] sm:$0xff]  ;;  %v1125_v20 = vld [vmem:[%s4805_s3 + $0x10] sm:$0xff] }
  0x26   : > { %3196 = vmatprep.subr.mxu0 %v2768_v21  ;;  %3207 = vmatprep.subr.mxu1 %v430_v22 }
  0x27   : > { %3197 = vmatpush3.msra.mxu0 %v2768_v21  ;;  %3208 = vmatpush3.msra.mxu1 %v430_v22  ;;  %v1124_v21 = vld [vmem:[%s4805_s3 + $0x8] sm:$0xff]  ;;  %v1123_v22 = vld [vmem:[%s4805_s3] sm:$0xff] }
  0x28   : > { %3198 = vmatprep.subr.mxu0 %v2767_v23  ;;  %3209 = vmatprep.subr.mxu1 %v429_v24 }
  0x29   : > { %3199 = vmatpush3.msra.mxu0 %v2767_v23  ;;  %3210 = vmatpush3.msra.mxu1 %v429_v24  ;;  %v2795_v23 = vld [vmem:[%s4805_s3 + $0x48] sm:$0xff]  ;;  %v2794_v24 = vld [vmem:[%s4805_s3 + $0x40] sm:$0xff] }
  0x2a   : > { %3214 = vmatprep.subr.mxu0 %v3875_v5  ;;  %3225 = vmatprep.subr.mxu1 %v2780_v37 }
  0xe1   : > { %v3180_v26 = vpop.f32.mrf.mxu0  ;;  %v3191_v27 = vpop.f32.mrf.mxu1 }
  0xe3   : > { %v420_v28 = vpop.f32.mrf.mxu0  ;;  %v509_v29 = vpop.f32.mrf.mxu1 }
  0xe4   : > { %3200 = vmatprep.mubr.msk.f32.mxu0 %vm347_vm4, %v509_v29  ;;  %3211 = vmatprep.mubr.msk.f32.mxu1 %vm347_vm4, %v420_v28 }
  0xe5   : > { %3201 = vmatmul.mubr.msk.f32.vlgmr.msra.gmra.mxu0 %vm347_vm4, %v3191_v27  ;;  %3212 = vmatmul.mubr.msk.f32.vlgmr.msra.gmra.mxu1 %vm347_vm4, %v3180_v26  ;;  %v2811_v27 = vld [vmem:[%s4805_s3 + $0xb0] sm:$0xff] }
  0xe6   : > { %3215 = vmatpush3.msra.mxu0 %v3875_v5  ;;  %3222 = vmatprep.mubr.msk.f32.mxu0 %vm347_vm4, %v3951_v30 }
  0xe7   : > { %3216 = vmatprep.subr.mxu0 %v3877_v6  ;;  %3226 = vmatpush3.msra.mxu1 %v2780_v37  ;;  %v2808_v37 = vld [vmem:[%s4805_s3 + $0x98] sm:$0xff] }
  0xe8   : > { %3217 = vmatpush3.msra.mxu0 %v3877_v6  ;;  %3227 = vmatprep.subr.mxu1 %v2779_v38 }
  0xe9   : > { %3218 = vmatprep.subr.mxu0 %v3886_v9  ;;  %3228 = vmatpush3.msra.mxu1 %v2779_v38  ;;  %v2820_v38 = vld [vmem:[%s4805_s3 + $0xe8] sm:$0xff] }
  0xea   : > { %3219 = vmatpush3.msra.mxu0 %v3886_v9  ;;  %3229 = vmatprep.subr.mxu1 %v2778_v39 }
  0xeb   : > { %3220 = vmatprep.subr.mxu0 %v3896_v11  ;;  %3230 = vmatpush3.msra.mxu1 %v2778_v39  ;;  %v2807_v39 = vld [vmem:[%s4805_s3 + $0x90] sm:$0xff] }
  0xec   : > { %3221 = vmatpush3.msra.mxu0 %v3896_v11  ;;  %3231 = vmatprep.subr.mxu1 %v2777_v40 }
  0xed   : > { %3223 = vmatmul.mubr.msk.f32.vlgmr.msra.gmra.mxu0 %vm347_vm4, %v690_v33  ;;  %3236 = vmatprep.subr.mxu0 %v3875_v5  ;;  %v2822_v33 = vld [vmem:[%s4805_s3 + $0xf8] sm:$0xff] }
  0xee   : > { %3237 = vmatpush3.msra.mxu0 %v3875_v5  ;;  %3244 = vmatprep.mubr.msk.f32.mxu0 %vm347_vm4, %v3971_v34 }
  0xef   : > { %3238 = vmatprep.subr.mxu0 %v3877_v6  ;;  %3232 = vmatpush3.msra.mxu1 %v2777_v40  ;;  %v2819_v40 = vld [vmem:[%s4805_s3 + $0xe0] sm:$0xff] }
  0xf0   : > { %3239 = vmatpush3.msra.mxu0 %v3877_v6  ;;  %3247 = vmatprep.subr.mxu1 %v2788_v41 }
  0xf1   : > { %3240 = vmatprep.subr.mxu0 %v3886_v9 }
  0xf2   : > { %3241 = vmatpush3.msra.mxu0 %v3886_v9 }
  0xf3   : > { %3242 = vmatprep.subr.mxu0 %v3896_v11 }
  0xf4   : > { %3243 = vmatpush3.msra.mxu0 %v3896_v11 }
  0xf5   : > { %3245 = vmatmul.mubr.msk.f32.vlgmr.msra.gmra.mxu0 %vm347_vm4, %v865_v36  ;;  %3272 = vmatprep.subr.mxu0 %v3765_v12  ;;  %v2821_v36 = vld [vmem:[%s4805_s3 + $0xf0] sm:$0xff] }
  0xf6   : > { %3288 = vmatprep.mubr.msk.f32.mxu0 %vm3766_vm9, %v3765_v12  ;;  %3273 = vmatpush3.msra.mxu0 %v2801_v51 }
  0xf7   : > { %3274 = vmatprep.subr.mxu0 %v3765_v12 }
  0xf8   : > { %3275 = vmatpush3.msra.mxu0 %v2800_v52 }
  0xf9   : > { %3276 = vmatprep.subr.mxu0 %v3765_v12 }
  0xfa   : > { %3277 = vmatpush3.msra.mxu0 %v2799_v53 }
  0xfb   : > { %3278 = vmatprep.subr.mxu0 %v3765_v12 }
  0xfc   : > { %3279 = vmatpush3.msra.mxu0 %v2798_v54 }
  0xfd   : > { %3280 = vmatprep.subr.mxu0 %v3765_v12 }
  0xfe   : > { %3281 = vmatpush3.msra.mxu0 %v2797_v55 }
  0xff   : > { %3282 = vmatprep.subr.mxu0 %v3765_v12 }
 0x100   : > { %3283 = vmatpush3.msra.mxu0 %v2796_v56  ;;  %v2842_v56 = vld [vmem:[%s4807_s5 + $0xf8] sm:$0xff] }
 0x101   : > { %3284 = vmatprep.subr.mxu0 %v3765_v12 }
 0x102   : > { %3285 = vmatpush3.msra.mxu0 %v2795_v23  ;;  %v1762_v23 = vld [vmem:[%s4807_s5 + $0x48] sm:$0xff] }
 0x103   : > { %3286 = vmatprep.subr.mxu0 %v3765_v12 }
 0x104   : > { %3287 = vmatpush3.msra.mxu0 %v2794_v24  ;;  %v1761_v24 = vld [vmem:[%s4807_s5 + $0x40] sm:$0xff] }
 0x105   : > { %3310 = vmatprep.subr.mxu0 %v3765_v12 }
 0x1a5   : > { %v3202_v42 = vpop.f32.mrf.mxu0  ;;  %v3213_v57 = vpop.f32.mrf.mxu1 }
 0x1a6   : > { %v682_v60 = vadd.f32 %v3213_v57, %v3202_v42  ;;  %v2818_v42 = vld [vmem:[%s4805_s3 + $0xd8] sm:$0xff]  ;;  %v2841_v57 = vld [vmem:[%s4807_s5 + $0xf0] sm:$0xff] }
 0x1a7   : > { %v595_v43 = vpop.f32.mrf.mxu0  ;;  %v676_v58 = vpop.f32.mrf.mxu1 }
 0x1a8   : > { %v677_v62 = vadd.f32 %v676_v58, %v595_v43  ;;  %v2805_v43 = vld [vmem:[%s4805_s3 + $0x80] sm:$0xff]  ;;  %v2840_v58 = vld [vmem:[%s4807_s5 + $0xe8] sm:$0xff] }
 0x1ad   : > { %v3224_v44 = vpop.f32.mrf.mxu0 }
 0x1af   : > { %v763_v45 = vpop.f32.mrf.mxu0 }
 0x1b0   : > { %3233 = vmatprep.mubr.msk.f32.mxu1 %vm347_vm4, %v763_v45  ;;  %v2816_v45 = vld [vmem:[%s4805_s3 + $0xc8] sm:$0xff] }
 0x1b1   : > { %3234 = vmatmul.mubr.msk.f32.vlgmr.msra.gmra.mxu1 %vm347_vm4, %v3224_v44  ;;  %v2817_v44 = vld [vmem:[%s4805_s3 + $0xd0] sm:$0xff] }
 0x1b2   : > { %3248 = vmatpush3.msra.mxu1 %v2788_v41  ;;  %v2806_v41 = vld [vmem:[%s4805_s3 + $0x88] sm:$0xff] }
 0x1b3   : > { %3249 = vmatprep.subr.mxu1 %v2787_v46 }
 0x1b4   : > { %3250 = vmatpush3.msra.mxu1 %v2787_v46  ;;  %v2815_v46 = vld [vmem:[%s4805_s3 + $0xc0] sm:$0xff] }
 0x1b5   : > { %v3246_v49 = vpop.f32.mrf.mxu0  ;;  %3251 = vmatprep.subr.mxu1 %v2786_v47 }
 0x1b6   : > { %3252 = vmatpush3.msra.mxu1 %v2786_v47 }
 0x1b7   : > { %v938_v50 = vpop.f32.mrf.mxu0  ;;  %3253 = vmatprep.subr.mxu1 %v2785_v48 }
 0x1b8   : > { %3254 = vmatpush3.msra.mxu1 %v2785_v48  ;;  %3255 = vmatprep.mubr.msk.f32.mxu1 %vm347_vm4, %v938_v50 }
 0x1b9   : > { %3256 = vmatmul.mubr.msk.f32.vlgmr.msra.gmra.mxu1 %vm347_vm4, %v3246_v49  ;;  %3258 = vmatprep.subr.mxu1 %v3765_v12 }
 0x1ba   : > { %3262 = vmatprep.mubr.msk.f32.mxu1 %vm3766_vm9, %v3765_v12 }
 0x271   : > { %v3235_v59 = vpop.f32.mrf.mxu1 }
 0x272   : > { %v859_v63 = vadd.f32 %v3235_v59, %v682_v60  ;;  %v2839_v59 = vld [vmem:[%s4807_s5 + $0xe0] sm:$0xff]  ;;  %v2838_v60 = vld [vmem:[%s4807_s5 + $0xd8] sm:$0xff] }
 0x273   : > { %v849_v61 = vpop.f32.mrf.mxu1 }
 0x274   : > { %v858_v2 = vadd.f32 %v849_v61, %v677_v62  ;;  %v2837_v61 = vld [vmem:[%s4807_s5 + $0xd0] sm:$0xff]  ;;  %v2836_v62 = vld [vmem:[%s4807_s5 + $0xc8] sm:$0xff] }
 0x279   : > { %v3257_v0 = vpop.f32.mrf.mxu1 }
 0x27a   : > { %v1034_v3 = vadd.f32 %v3257_v0, %v859_v63  ;;  %v2835_v63 = vld [vmem:[%s4807_s5 + $0xc0] sm:$0xff]  ;;  %v2834_v0 = vld [vmem:[%s4807_s5 + $0xb8] sm:$0xff] }
 0x27b   : > { %v1024_v4 = vpop.f32.mrf.mxu1 }
 0x27c   : > { %v1043_v5 = vadd.f32 %v2791_v1, %v1034_v3  ;;  %v1033_v6 = vadd.f32 %v1024_v4, %v858_v2  ;;  %v2832_v2 = vld [vmem:[%s4807_s5 + $0xa8] sm:$0xff]  ;;  %v2831_v3 = vld [vmem:[%s4807_s5 + $0xa0] sm:$0xff]  ;;  %v2830_v4 = vld [vmem:[%s4807_s5 + $0x98] sm:$0xff] }
 0x27e   : > { %v1047_v7 = vmul.f32 0.2, %v1043_v5  ;;  %v1042_v8 = vadd.f32 %v2791_v1, %v1033_v6  ;;  %vm1045_vm10 = vcmp.ge.f32.partialorder %v1043_v5, 0.0  ;;  %v2833_v1 = vld [vmem:[%s4807_s5 + $0xb0] sm:$0xff] }
 0x280   : > { %v1046_v9 = vmul.f32 0.2, %v1042_v8  ;;  %v4050_v10 = vsel %vm1045_vm10, %v1043_v5, %v1047_v7  ;;  %vm1044_vm11 = vcmp.ge.f32.partialorder %v1042_v8, 0.0  ;;  %v2829_v5 = vld [vmem:[%s4807_s5 + $0x90] sm:$0xff] }
 0x281   : > { %3259 = vmatpush3.msra.mxu1 %v4050_v10 }
 0x282   : > { %3260 = vmatprep.subr.mxu1 %v3765_v12  ;;  %v4054_v11 = vsel %vm1044_vm11, %v1042_v8, %v1046_v9 }
 0x283   : > { %3261 = vmatpush3.msra.mxu1 %v4054_v11 }
 0x284   : > { %3263 = vmatmul.mubr.msk.f32.vlgmr.msra.gmra.mxu1 %vm1050_vm12, %v3904_v13  ;;  %3265 = vmatprep.subr.mxu1 %v3765_v12 }
 0x285   : > { %3266 = vmatpush3.msra.mxu1 %v4050_v10  ;;  %3269 = vmatprep.mubr.msk.f32.mxu1 %vm3766_vm9, %v3765_v12 }
 0x286   : > { %3267 = vmatprep.subr.mxu1 %v3765_v12 }
 0x287   : > { %3268 = vmatpush3.msra.mxu1 %v4054_v11 }
 0x288   : > { %3270 = vmatmul.mubr.msk.f32.vlgmr.msra.gmra.mxu1 %vm1050_vm12, %v3909_v14  ;;  %3291 = vmatprep.subr.mxu1 %v3765_v12 }
 0x289   : > { %3292 = vmatpush3.msra.mxu1 %v1130_v15  ;;  %3307 = vmatprep.mubr.msk.f32.mxu1 %vm3766_vm9, %v3765_v12 }
 0x28a   : > { %3293 = vmatprep.subr.mxu1 %v3765_v12 }
 0x28b   : > { %3294 = vmatpush3.msra.mxu1 %v1129_v16 }
 0x28c   : > { %3295 = vmatprep.subr.mxu1 %v3765_v12 }
 0x28d   : > { %3296 = vmatpush3.msra.mxu1 %v1128_v17 }
 0x28e   : > { %3297 = vmatprep.subr.mxu1 %v3765_v12 }
 0x28f   : > { %3298 = vmatpush3.msra.mxu1 %v1127_v18 }
 0x290   : > { %3299 = vmatprep.subr.mxu1 %v3765_v12 }
 0x291   : > { %3300 = vmatpush3.msra.mxu1 %v1126_v19  ;;  %v1768_v19 = vld [vmem:[%s4807_s5 + $0x78] sm:$0xff] }
 0x292   : > { %3301 = vmatprep.subr.mxu1 %v3765_v12 }
 0x293   : > { %3302 = vmatpush3.msra.mxu1 %v1125_v20  ;;  %v1766_v20 = vld [vmem:[%s4807_s5 + $0x68] sm:$0xff] }
 0x294   : > { %3303 = vmatprep.subr.mxu1 %v3765_v12 }
 0x295   : > { %3304 = vmatpush3.msra.mxu1 %v1124_v21  ;;  %v1764_v21 = vld [vmem:[%s4807_s5 + $0x58] sm:$0xff] }
 0x296   : > { %3305 = vmatprep.subr.mxu1 %v3765_v12 }
 0x297   : > { %3306 = vmatpush3.msra.mxu1 %v1123_v22  ;;  %v1763_v22 = vld [vmem:[%s4807_s5 + $0x50] sm:$0xff] }
 0x298   : > { %3317 = vmatprep.subr.mxu1 %v3765_v12 }
 0x344   : > { %v1119_v26 = vpop.f32.mrf.mxu1 }
 0x345   : > { %3308 = vmatmul.mubr.msk.f32.vlgmr.msra.gmra.mxu1 %vm1212_vm13, %v1119_v26  ;;  %v1759_v26 = vld [vmem:[%s4807_s5 + $0x30] sm:$0xff] }
 0x346   : > { %v3264_v28 = vpop.f32.mrf.mxu1  ;;  %3318 = vmatpush3.msra.mxu1 %v2812_v25  ;;  %3333 = vmatprep.mubr.msk.f32.mxu1 %vm3766_vm9, %v3765_v12  ;;  %v1760_v25 = vld [vmem:[%s4807_s5 + $0x38] sm:$0xff] }
 0x347   : > { %3319 = vmatprep.subr.mxu1 %v3765_v12  ;;  %v1757_v28 = vld [vmem:[%s4807_s5 + $0x20] sm:$0xff] }
 0x348   : > { %v1199_v29 = vpop.f32.mrf.mxu1  ;;  %3320 = vmatpush3.msra.mxu1 %v2811_v27  ;;  %v1758_v27 = vld [vmem:[%s4807_s5 + $0x28] sm:$0xff] }
 0x349   : > { %3289 = vmatmul.mubr.msk.f32.vlgmr.msra.gmra.mxu0 %vm1212_vm13, %v1199_v29  ;;  %3321 = vmatprep.subr.mxu1 %v3765_v12  ;;  %v1756_v29 = vld [vmem:[%s4807_s5 + $0x18] sm:$0xff] }
 0x34a   : > { %3311 = vmatpush3.msra.mxu0 %v4050_v10  ;;  %v3271_v32 = vpop.f32.mrf.mxu1  ;;  %3314 = vmatprep.mubr.msk.f32.mxu0 %vm3766_vm9, %v3765_v12 }
 0x34b   : > { %3312 = vmatprep.subr.mxu0 %v3765_v12  ;;  %3322 = vmatpush3.msra.mxu1 %v2810_v31  ;;  %v1755_v31 = vld [vmem:[%s4807_s5 + $0x10] sm:$0xff]  ;;  %v1754_v32 = vld [vmem:[%s4807_s5 + $0x8] sm:$0xff] }
 0x34c   : > { %3313 = vmatpush3.msra.mxu0 %v4054_v11  ;;  %3323 = vmatprep.subr.mxu1 %v3765_v12 }
 0x34d   : > { %3336 = vmatprep.subr.mxu0 %v3765_v12  ;;  %3315 = vmatmul.mubr.msk.f32.vlgmr.msra.gmra.mxu0 %vm1050_vm12, %v3951_v30 }
 0x34e   : > { %3337 = vmatpush3.msra.mxu0 %v4050_v10  ;;  %3340 = vmatprep.mubr.msk.f32.mxu0 %vm3766_vm9, %v3765_v12  ;;  %v2824_v10 = vld [vmem:[%s4806_s4] ss:$0 sm:$0xff] }
 0x34f   : > { %3338 = vmatprep.subr.mxu0 %v3765_v12  ;;  %3324 = vmatpush3.msra.mxu1 %v2809_v35  ;;  %v1753_v35 = vld [vmem:[%s4807_s5] sm:$0xff] }
 0x350   : > { %3339 = vmatpush3.msra.mxu0 %v4054_v11  ;;  %3325 = vmatprep.subr.mxu1 %v3765_v12 }
 0x351   : > { %3341 = vmatmul.mubr.msk.f32.vlgmr.msra.gmra.mxu0 %vm1050_vm12, %v3971_v34  ;;  %3343 = vmatprep.subr.mxu0 %v3765_v12 }
 0x352   : > { %3344 = vmatpush3.msra.mxu0 %v2822_v33  ;;  %3359 = vmatprep.mubr.msk.f32.mxu0 %vm3766_vm9, %v3765_v12  ;;  %v2828_v33 = vld [vmem:[%s4807_s5 + $0x88] sm:$0xff] }
 0x353   : > { %3345 = vmatprep.subr.mxu0 %v3765_v12  ;;  %3326 = vmatpush3.msra.mxu1 %v2808_v37  ;;  %v2859_v37 = vld [vmem:[%s4807_s5 + $0x178] sm:$0xff] }
 0x354   : > { %3346 = vmatpush3.msra.mxu0 %v2821_v36  ;;  %3327 = vmatprep.subr.mxu1 %v3765_v12  ;;  %v2827_v36 = vld [vmem:[%s4807_s5 + $0x80] sm:$0xff] }
 0x355   : > { %3347 = vmatprep.subr.mxu0 %v3765_v12  ;;  %3328 = vmatpush3.msra.mxu1 %v2807_v39  ;;  %v2858_v39 = vld [vmem:[%s4807_s5 + $0x170] sm:$0xff] }
 0x356   : > { %3348 = vmatpush3.msra.mxu0 %v2820_v38  ;;  %3329 = vmatprep.subr.mxu1 %v3765_v12 }
 0x357   : > { %3349 = vmatprep.subr.mxu0 %v3765_v12  ;;  %3330 = vmatpush3.msra.mxu1 %v2806_v41 }
 0x358   : > { %3350 = vmatpush3.msra.mxu0 %v2819_v40  ;;  %3331 = vmatprep.subr.mxu1 %v3765_v12 }
 0x359   : > { %3351 = vmatprep.subr.mxu0 %v3765_v12  ;;  %3332 = vmatpush3.msra.mxu1 %v2805_v43 }
 0x35a   : > { %3352 = vmatpush3.msra.mxu0 %v2818_v42  ;;  %3362 = vmatprep.subr.mxu1 %v3765_v12  ;;  %v2857_v42 = vld [vmem:[%s4807_s5 + $0x168] sm:$0xff] }
 0x35b   : > { %3353 = vmatprep.subr.mxu0 %v3765_v12 }
 0x35c   : > { %3354 = vmatpush3.msra.mxu0 %v2817_v44  ;;  %v2856_v44 = vld [vmem:[%s4807_s5 + $0x160] sm:$0xff] }
 0x35d   : > { %3355 = vmatprep.subr.mxu0 %v3765_v12 }
 0x35e   : > { %3356 = vmatpush3.msra.mxu0 %v2816_v45  ;;  %v2855_v45 = vld [vmem:[%s4807_s5 + $0x158] sm:$0xff] }
 0x35f   : > { %3357 = vmatprep.subr.mxu0 %v3765_v12 }
 0x360   : > { %3358 = vmatpush3.msra.mxu0 %v2815_v46  ;;  %v2876_v46 = vld [vmem:[%s4807_s5 + $0x1f8] sm:$0xff] }
 0x361   : > { %3372 = vmatprep.subr.mxu0 %v3765_v12 }
 0x405   : > { %v1355_v47 = vpop.f32.mrf.mxu1 }
 0x407   : > { %v3309_v48 = vpop.f32.mrf.mxu1 }
 0x408   : > { %v2853_v48 = vld [vmem:[%s4807_s5 + $0x148] sm:$0xff] }
 0x409   : > { %v1282_v49 = vpop.f32.mrf.mxu0 }
 0x40a   : > { %v1356_v50 = vadd.f32 %v1355_v47, %v1282_v49  ;;  %v2875_v47 = vld [vmem:[%s4807_s5 + $0x1f0] sm:$0xff]  ;;  %v2874_v49 = vld [vmem:[%s4807_s5 + $0x1e8] sm:$0xff] }
 0x40b   : > { %v3290_v51 = vpop.f32.mrf.mxu0 }
 0x40c   : > { %v2851_v51 = vld [vmem:[%s4807_s5 + $0x138] sm:$0xff] }
 0x40d   : > { %v1427_v52 = vpop.f32.mrf.mxu0 }
 0x40e   : > { %3334 = vmatmul.mubr.msk.f32.vlgmr.msra.gmra.mxu1 %vm1212_vm13, %v1427_v52  ;;  %v2872_v52 = vld [vmem:[%s4807_s5 + $0x1d8] sm:$0xff] }
 0x40f   : > { %v3316_v53 = vpop.f32.mrf.mxu0  ;;  %3364 = vmatprep.mubr.msk.f32.mxu1 %vm3766_vm9, %v3765_v12 }
 0x410   : > { %v2850_v53 = vld [vmem:[%s4807_s5 + $0x130] sm:$0xff] }
 0x411   : > { %v1582_v54 = vpop.f32.mrf.mxu0 }
 0x412   : > { %3360 = vmatmul.mubr.msk.f32.vlgmr.msra.gmra.mxu0 %vm1212_vm13, %v1582_v54  ;;  %v2871_v54 = vld [vmem:[%s4807_s5 + $0x1d0] sm:$0xff] }
 0x413   : > { %v3342_v55 = vpop.f32.mrf.mxu0  ;;  %3404 = vmatprep.mubr.msk.f32.mxu0 %vm3766_vm9, %v3765_v12  ;;  %3373 = vmatpush3.msra.mxu0 %v2842_v56  ;;  %v2870_v56 = vld [vmem:[%s4807_s5 + $0x1c8] sm:$0xff] }
 0x414   : > { %3374 = vmatprep.subr.mxu0 %v3765_v12  ;;  %v2849_v55 = vld [vmem:[%s4807_s5 + $0x128] sm:$0xff] }
 0x415   : > { %3375 = vmatpush3.msra.mxu0 %v2841_v57  ;;  %v2848_v57 = vld [vmem:[%s4807_s5 + $0x120] sm:$0xff] }
 0x416   : > { %3376 = vmatprep.subr.mxu0 %v3765_v12 }
 0x417   : > { %3377 = vmatpush3.msra.mxu0 %v2840_v58  ;;  %v2869_v58 = vld [vmem:[%s4807_s5 + $0x1c0] sm:$0xff] }
 0x418   : > { %3378 = vmatprep.subr.mxu0 %v3765_v12 }
 0x419   : > { %3379 = vmatpush3.msra.mxu0 %v2839_v59  ;;  %v2868_v59 = vld [vmem:[%s4807_s5 + $0x1b8] sm:$0xff] }
 0x41a   : > { %3380 = vmatprep.subr.mxu0 %v3765_v12 }
 0x41b   : > { %3381 = vmatpush3.msra.mxu0 %v2838_v60  ;;  %v2867_v60 = vld [vmem:[%s4807_s5 + $0x1b0] sm:$0xff] }
 0x41c   : > { %3382 = vmatprep.subr.mxu0 %v3765_v12 }
 0x41d   : > { %3383 = vmatpush3.msra.mxu0 %v2837_v61  ;;  %v2847_v61 = vld [vmem:[%s4807_s5 + $0x118] sm:$0xff] }
 0x41e   : > { %3384 = vmatprep.subr.mxu0 %v3765_v12 }
 0x41f   : > { %3385 = vmatpush3.msra.mxu0 %v2836_v62  ;;  %v2866_v62 = vld [vmem:[%s4807_s5 + $0x1a8] sm:$0xff] }
 0x420   : > { %3386 = vmatprep.subr.mxu0 %v3765_v12 }
 0x421   : > { %3387 = vmatpush3.msra.mxu0 %v2835_v63  ;;  %v2846_v63 = vld [vmem:[%s4807_s5 + $0x110] sm:$0xff] }
 0x422   : > { %3388 = vmatprep.subr.mxu0 %v3765_v12 }
 0x423   : > { %3389 = vmatpush3.msra.mxu0 %v2834_v0  ;;  %v2865_v0 = vld [vmem:[%s4807_s5 + $0x1a0] sm:$0xff] }
 0x424   : > { %3390 = vmatprep.subr.mxu0 %v3765_v12 }
 0x425   : > { %3391 = vmatpush3.msra.mxu0 %v2833_v1  ;;  %v2845_v1 = vld [vmem:[%s4807_s5 + $0x108] sm:$0xff] }
 0x426   : > { %3392 = vmatprep.subr.mxu0 %v3765_v12 }
 0x427   : > { %3393 = vmatpush3.msra.mxu0 %v2832_v2  ;;  %v2864_v2 = vld [vmem:[%s4807_s5 + $0x198] sm:$0xff] }
 0x428   : > { %3394 = vmatprep.subr.mxu0 %v3765_v12 }
 0x429   : > { %3395 = vmatpush3.msra.mxu0 %v2831_v3  ;;  %v2844_v3 = vld [vmem:[%s4807_s5 + $0x100] sm:$0xff] }
 0x42a   : > { %3396 = vmatprep.subr.mxu0 %v3765_v12 }
 0x42b   : > { %3397 = vmatpush3.msra.mxu0 %v2830_v4  ;;  %v2863_v4 = vld [vmem:[%s4807_s5 + $0x190] sm:$0xff] }
 0x42c   : > { %3398 = vmatprep.subr.mxu0 %v3765_v12 }
 0x42d   : > { %3399 = vmatpush3.msra.mxu0 %v2829_v5  ;;  %v2862_v5 = vld [vmem:[%s4807_s5 + $0x188] sm:$0xff] }
 0x42e   : > { %3400 = vmatprep.subr.mxu0 %v3765_v12 }
 0x42f   : > { %3401 = vmatpush3.msra.mxu0 %v2828_v33  ;;  %v2885_v33 = vld [vmem:[%s4809_s7 + $0xb8] sm:$0xff] }
 0x430   : > { %3402 = vmatprep.subr.mxu0 %v3765_v12 }
 0x431   : > { %3403 = vmatpush3.msra.mxu0 %v2827_v36  ;;  %v2336_v36 = vld [vmem:[%s4809_s7 + $0x38] sm:$0xff] }
 0x432   : > { %3442 = vmatprep.subr.mxu0 %v3765_v12 }
 0x4ce   : > { %v1509_v6 = vpop.f32.mrf.mxu1 }
 0x4cf   : > { %v1513_v8 = vadd.f32 %v1509_v6, %v1356_v50  ;;  %v2873_v50 = vld [vmem:[%s4807_s5 + $0x1e0] sm:$0xff] }
 0x4d0   : > { %v3335_v7 = vpop.f32.mrf.mxu1  ;;  %v2861_v6 = vld [vmem:[%s4807_s5 + $0x180] sm:$0xff] }
 0x4d2   : > { %v1664_v9 = vpop.f32.mrf.mxu0 }
 0x4d3   : > { %v1668_v11 = vadd.f32 %v1664_v9, %v1513_v8 }
 0x4d4   : > { %v3361_v15 = vpop.f32.mrf.mxu0 }
 0x4d5   : > { %v1676_v16 = vadd.f32 %v2824_v10, %v1668_v11  ;;  %v2893_v15 = vld [vmem:[%s4809_s7 + $0xf8] sm:$0xff] }
 0x4d7   : > { %v1678_v17 = vmul.f32 0.2, %v1676_v16  ;;  %vm1677_vm14 = vcmp.ge.f32.partialorder %v1676_v16, 0.0 }
 0x4d9   : > { %v4261_v18 = vsel %vm1677_vm14, %v1676_v16, %v1678_v17  ;;  %v2892_v17 = vld [vmem:[%s4809_s7 + $0xf0] sm:$0xff] }
 0x4da   : > { %3363 = vmatpush3.msra.mxu1 %v4261_v18 }
 0x4db   : > { %3365 = vmatmul.mubr.msk.f32.vlgmr.msra.gmra.mxu1 %vm1680_vm15, %v3904_v13  ;;  %3367 = vmatprep.subr.mxu1 %v3765_v12  ;;  %v1767_v13 = vld [vmem:[%s4807_s5 + $0x70] sm:$0xff] }
 0x4dc   : > { %3368 = vmatpush3.msra.mxu1 %v4261_v18  ;;  %3369 = vmatprep.mubr.msk.f32.mxu1 %vm3766_vm9, %v3765_v12 }
 0x4dd   : > { %3407 = vmatprep.subr.mxu1 %v3765_v12 }
 0x4df   : > { %3370 = vmatmul.mubr.msk.f32.vlgmr.msra.gmra.mxu1 %vm1680_vm15, %v3909_v14  ;;  %v1765_v14 = vld [vmem:[%s4807_s5 + $0x60] sm:$0xff] }
 0x4e0   : > { %3408 = vmatpush3.msra.mxu1 %v1768_v19  ;;  %3439 = vmatprep.mubr.msk.f32.mxu1 %vm3766_vm9, %v3765_v12  ;;  %v2344_v19 = vld [vmem:[%s4809_s7 + $0x78] sm:$0xff] }
 0x4e1   : > { %3409 = vmatprep.subr.mxu1 %v3765_v12 }
 0x4e2   : > { %3410 = vmatpush3.msra.mxu1 %v1767_v13  ;;  %v2891_v13 = vld [vmem:[%s4809_s7 + $0xe8] sm:$0xff] }
 0x4e3   : > { %3411 = vmatprep.subr.mxu1 %v3765_v12 }
 0x4e4   : > { %3412 = vmatpush3.msra.mxu1 %v1766_v20 }
 0x4e5   : > { %3413 = vmatprep.subr.mxu1 %v3765_v12 }
 0x4e6   : > { %3414 = vmatpush3.msra.mxu1 %v1765_v14  ;;  %v2343_v14 = vld [vmem:[%s4809_s7 + $0x70] sm:$0xff] }
 0x4e7   : > { %3415 = vmatprep.subr.mxu1 %v3765_v12 }
 0x4e8   : > { %3416 = vmatpush3.msra.mxu1 %v1764_v21  ;;  %v2890_v21 = vld [vmem:[%s4809_s7 + $0xe0] sm:$0xff] }
 0x4e9   : > { %3417 = vmatprep.subr.mxu1 %v3765_v12 }
 0x4ea   : > { %3418 = vmatpush3.msra.mxu1 %v1763_v22 }
 0x4eb   : > { %3419 = vmatprep.subr.mxu1 %v3765_v12 }
 0x4ec   : > { %3420 = vmatpush3.msra.mxu1 %v1762_v23  ;;  %v2342_v23 = vld [vmem:[%s4809_s7 + $0x68] sm:$0xff] }
 0x4ed   : > { %3421 = vmatprep.subr.mxu1 %v3765_v12 }
 0x4ee   : > { %3422 = vmatpush3.msra.mxu1 %v1761_v24  ;;  %v2889_v24 = vld [vmem:[%s4809_s7 + $0xd8] sm:$0xff] }
 0x4ef   : > { %3423 = vmatprep.subr.mxu1 %v3765_v12 }
 0x4f0   : > { %3424 = vmatpush3.msra.mxu1 %v1760_v25  ;;  %v2341_v25 = vld [vmem:[%s4809_s7 + $0x60] sm:$0xff] }
 0x4f1   : > { %3425 = vmatprep.subr.mxu1 %v3765_v12 }
 0x4f2   : > { %3426 = vmatpush3.msra.mxu1 %v1759_v26  ;;  %v2888_v26 = vld [vmem:[%s4809_s7 + $0xd0] sm:$0xff] }
 0x4f3   : > { %3427 = vmatprep.subr.mxu1 %v3765_v12 }
 0x4f4   : > { %3428 = vmatpush3.msra.mxu1 %v1758_v27  ;;  %v2340_v27 = vld [vmem:[%s4809_s7 + $0x58] sm:$0xff] }
 0x4f5   : > { %3429 = vmatprep.subr.mxu1 %v3765_v12 }
 0x4f6   : > { %3430 = vmatpush3.msra.mxu1 %v1757_v28  ;;  %v2887_v28 = vld [vmem:[%s4809_s7 + $0xc8] sm:$0xff] }
 0x4f7   : > { %3431 = vmatprep.subr.mxu1 %v3765_v12 }
 0x4f8   : > { %3432 = vmatpush3.msra.mxu1 %v1756_v29  ;;  %v2339_v29 = vld [vmem:[%s4809_s7 + $0x50] sm:$0xff] }
 0x4f9   : > { %3433 = vmatprep.subr.mxu1 %v3765_v12 }
 0x4fa   : > { %3434 = vmatpush3.msra.mxu1 %v1755_v31  ;;  %v2886_v31 = vld [vmem:[%s4809_s7 + $0xc0] sm:$0xff] }
 0x4fb   : > { %3435 = vmatprep.subr.mxu1 %v3765_v12 }
 0x4fc   : > { %3436 = vmatpush3.msra.mxu1 %v1754_v32  ;;  %v2338_v32 = vld [vmem:[%s4809_s7 + $0x48] sm:$0xff] }
 0x4fd   : > { %3437 = vmatprep.subr.mxu1 %v3765_v12 }
 0x4fe   : > { %3438 = vmatpush3.msra.mxu1 %v1753_v35  ;;  %v2337_v35 = vld [vmem:[%s4809_s7 + $0x40] sm:$0xff] }
 0x4ff   : > { %3447 = vmatprep.subr.mxu1 %v3765_v12 }
 0x59b   : > { %v1749_v38 = vpop.f32.mrf.mxu1 }
 0x59c   : > { %3440 = vmatmul.mubr.f32.vlgmr.msra.gmra.mxu1 %v1749_v38  ;;  %v2884_v38 = vld [vmem:[%s4809_s7 + $0xb0] sm:$0xff] }
 0x59d   : > { %v3366_v40 = vpop.f32.mrf.mxu1  ;;  %3448 = vmatpush3.msra.mxu1 %v2859_v37  ;;  %3479 = vmatprep.mubr.msk.f32.mxu1 %vm3766_vm9, %v3765_v12  ;;  %v2335_v37 = vld [vmem:[%s4809_s7 + $0x30] sm:$0xff] }
 0x59e   : > { %3449 = vmatprep.subr.mxu1 %v3765_v12  ;;  %v2883_v40 = vld [vmem:[%s4809_s7 + $0xa8] sm:$0xff] }
 0x59f   : > { %v1837_v41 = vpop.f32.mrf.mxu1  ;;  %3450 = vmatpush3.msra.mxu1 %v2858_v39  ;;  %v2334_v39 = vld [vmem:[%s4809_s7 + $0x28] sm:$0xff] }
 0x5a0   : > { %3405 = vmatmul.mubr.f32.vlgmr.msra.gmra.mxu0 %v1837_v41  ;;  %3451 = vmatprep.subr.mxu1 %v3765_v12  ;;  %v2333_v41 = vld [vmem:[%s4809_s7 + $0x20] sm:$0xff] }
 0x5a1   : > { %3443 = vmatpush3.msra.mxu0 %v4261_v18  ;;  %v3371_v43 = vpop.f32.mrf.mxu1  ;;  %3444 = vmatprep.mubr.msk.f32.mxu0 %vm3766_vm9, %v3765_v12 }
 0x5a2   : > { %3482 = vmatprep.subr.mxu0 %v3765_v12  ;;  %3452 = vmatpush3.msra.mxu1 %v2857_v42  ;;  %v2882_v42 = vld [vmem:[%s4809_s7 + $0xa0] sm:$0xff]  ;;  %v2332_v43 = vld [vmem:[%s4809_s7 + $0x18] sm:$0xff] }
 0x5a3   : > { %3453 = vmatprep.subr.mxu1 %v3765_v12 }
 0x5a4   : > { %3445 = vmatmul.mubr.msk.f32.vlgmr.msra.gmra.mxu0 %vm1680_vm15, %v3951_v30  ;;  %3454 = vmatpush3.msra.mxu1 %v2856_v44  ;;  %v2854_v30 = vld [vmem:[%s4807_s5 + $0x150] sm:$0xff]  ;;  %v2881_v44 = vld [vmem:[%s4809_s7 + $0x98] sm:$0xff] }
 0x5a5   : > { %3483 = vmatpush3.msra.mxu0 %v4261_v18  ;;  %3484 = vmatprep.mubr.msk.f32.mxu0 %vm3766_vm9, %v3765_v12 }
 0x5a6   : > { %3487 = vmatprep.subr.mxu0 %v3765_v12  ;;  %3455 = vmatprep.subr.mxu1 %v3765_v12 }
 0x5a7   : > { %3456 = vmatpush3.msra.mxu1 %v2855_v45  ;;  %v2331_v45 = vld [vmem:[%s4809_s7 + $0x10] sm:$0xff] }
 0x5a8   : > { %3485 = vmatmul.mubr.msk.f32.vlgmr.msra.gmra.mxu0 %vm1680_vm15, %v3971_v34  ;;  %3457 = vmatprep.subr.mxu1 %v3765_v12  ;;  %v2852_v34 = vld [vmem:[%s4807_s5 + $0x140] sm:$0xff] }
 0x5a9   : > { %3488 = vmatpush3.msra.mxu0 %v2876_v46  ;;  %3458 = vmatpush3.msra.mxu1 %v2854_v30  ;;  %v2880_v46 = vld [vmem:[%s4809_s7 + $0x90] sm:$0xff]  ;;  %v2330_v30 = vld [vmem:[%s4809_s7 + $0x8] sm:$0xff] }
 0x5aa   : > { %3489 = vmatprep.subr.mxu0 %v3765_v12  ;;  %3459 = vmatprep.subr.mxu1 %v3765_v12 }
 0x5ab   : > { %3490 = vmatpush3.msra.mxu0 %v2875_v47  ;;  %3460 = vmatpush3.msra.mxu1 %v2853_v48  ;;  %v2879_v47 = vld [vmem:[%s4809_s7 + $0x88] sm:$0xff]  ;;  %v2329_v48 = vld [vmem:[%s4809_s7] sm:$0xff] }
 0x5ac   : > { %3491 = vmatprep.subr.mxu0 %v3765_v12  ;;  %3461 = vmatprep.subr.mxu1 %v3765_v12 }
 0x5ad   : > { %3492 = vmatpush3.msra.mxu0 %v2874_v49  ;;  %3462 = vmatpush3.msra.mxu1 %v2852_v34  ;;  %v2878_v49 = vld [vmem:[%s4809_s7 + $0x80] sm:$0xff] }
 0x5ae   : > { %3493 = vmatprep.subr.mxu0 %v3765_v12  ;;  %3463 = vmatprep.subr.mxu1 %v3765_v12 }
 0x5af   : > { %3494 = vmatpush3.msra.mxu0 %v2873_v50  ;;  %3464 = vmatpush3.msra.mxu1 %v2851_v51 }
 0x5b0   : > { %3495 = vmatprep.subr.mxu0 %v3765_v12  ;;  %3465 = vmatprep.subr.mxu1 %v3765_v12 }
 0x5b1   : > { %3496 = vmatpush3.msra.mxu0 %v2872_v52  ;;  %3466 = vmatpush3.msra.mxu1 %v2850_v53  ;;  %v2877_v53 = vld [vmem:[%s4808_s6] ss:$0 sm:$0xff] }
 0x5b2   : > { %3497 = vmatprep.subr.mxu0 %v3765_v12  ;;  %3467 = vmatprep.subr.mxu1 %v3765_v12 }
 0x5b3   : > { %3498 = vmatpush3.msra.mxu0 %v2871_v54  ;;  %3468 = vmatpush3.msra.mxu1 %v2849_v55 }
 0x5b4   : > { %3499 = vmatprep.subr.mxu0 %v3765_v12  ;;  %3469 = vmatprep.subr.mxu1 %v3765_v12 }
 0x5b5   : > { %3500 = vmatpush3.msra.mxu0 %v2870_v56  ;;  %3470 = vmatpush3.msra.mxu1 %v2848_v57 }
 0x5b6   : > { %3501 = vmatprep.subr.mxu0 %v3765_v12  ;;  %3471 = vmatprep.subr.mxu1 %v3765_v12 }
 0x5b7   : > { %3502 = vmatpush3.msra.mxu0 %v2869_v58  ;;  %3519 = vmatprep.mubr.msk.f32.mxu0 %vm3766_vm9, %v3765_v12  ;;  %v2925_v58 = vld [vmem:[%s4809_s7 + $0x1f8] sm:$0xff] }
 0x5b8   : > { %3503 = vmatprep.subr.mxu0 %v3765_v12  ;;  %3472 = vmatpush3.msra.mxu1 %v2847_v61  ;;  %v2909_v61 = vld [vmem:[%s4809_s7 + $0x178] sm:$0xff] }
 0x5b9   : > { %3504 = vmatpush3.msra.mxu0 %v2868_v59  ;;  %3473 = vmatprep.subr.mxu1 %v3765_v12 }
 0x5ba   : > { %3505 = vmatprep.subr.mxu0 %v3765_v12  ;;  %3474 = vmatpush3.msra.mxu1 %v2846_v63  ;;  %v2908_v63 = vld [vmem:[%s4809_s7 + $0x170] sm:$0xff] }
 0x5bb   : > { %3506 = vmatpush3.msra.mxu0 %v2867_v60  ;;  %3475 = vmatprep.subr.mxu1 %v3765_v12 }
 0x5bc   : > { %3507 = vmatprep.subr.mxu0 %v3765_v12  ;;  %3476 = vmatpush3.msra.mxu1 %v2845_v1  ;;  %v2907_v1 = vld [vmem:[%s4809_s7 + $0x168] sm:$0xff] }
 0x5bd   : > { %3508 = vmatpush3.msra.mxu0 %v2866_v62  ;;  %3477 = vmatprep.subr.mxu1 %v3765_v12  ;;  %v2924_v62 = vld [vmem:[%s4809_s7 + $0x1f0] sm:$0xff] }
 0x5be   : > { %3509 = vmatprep.subr.mxu0 %v3765_v12  ;;  %3478 = vmatpush3.msra.mxu1 %v2844_v3  ;;  %v2906_v3 = vld [vmem:[%s4809_s7 + $0x160] sm:$0xff] }
 0x5bf   : > { %3510 = vmatpush3.msra.mxu0 %v2865_v0  ;;  %3522 = vmatprep.subr.mxu1 %v3765_v12  ;;  %v2923_v0 = vld [vmem:[%s4809_s7 + $0x1e8] sm:$0xff] }
 0x5c0   : > { %3511 = vmatprep.subr.mxu0 %v3765_v12 }
 0x5c1   : > { %3512 = vmatpush3.msra.mxu0 %v2864_v2  ;;  %v2922_v2 = vld [vmem:[%s4809_s7 + $0x1e0] sm:$0xff] }
 0x5c2   : > { %3513 = vmatprep.subr.mxu0 %v3765_v12 }
 0x5c3   : > { %3514 = vmatpush3.msra.mxu0 %v2863_v4  ;;  %v2921_v4 = vld [vmem:[%s4809_s7 + $0x1d8] sm:$0xff] }
 0x5c4   : > { %3515 = vmatprep.subr.mxu0 %v3765_v12 }
 0x5c5   : > { %3516 = vmatpush3.msra.mxu0 %v2862_v5  ;;  %v2905_v5 = vld [vmem:[%s4809_s7 + $0x158] sm:$0xff] }
 0x5c6   : > { %3517 = vmatprep.subr.mxu0 %v3765_v12 }
 0x5c7   : > { %3518 = vmatpush3.msra.mxu0 %v2861_v6  ;;  %v2920_v6 = vld [vmem:[%s4809_s7 + $0x1d0] sm:$0xff] }
 0x5c8   : > { %3557 = vmatprep.subr.mxu0 %v3765_v12 }
 0x65c   : > { %v1994_v7 = vpop.f32.mrf.mxu1 }
 0x65e   : > { %v3441_v8 = vpop.f32.mrf.mxu1 }
 0x65f   : > { %v2919_v8 = vld [vmem:[%s4809_s7 + $0x1c8] sm:$0xff] }
 0x660   : > { %v1924_v9 = vpop.f32.mrf.mxu0 }
 0x661   : > { %v4491_v10 = vadd.f32 %v1994_v7, %v1924_v9  ;;  %v2904_v7 = vld [vmem:[%s4809_s7 + $0x150] sm:$0xff]  ;;  %v2903_v9 = vld [vmem:[%s4809_s7 + $0x148] sm:$0xff] }
 0x662   : > { %v3406_v11 = vpop.f32.mrf.mxu0 }
 0x663   : > { %v2902_v11 = vld [vmem:[%s4809_s7 + $0x140] sm:$0xff] }
 0x664   : > { %v2066_v16 = vpop.f32.mrf.mxu0 }
 0x665   : > { %3480 = vmatmul.mubr.f32.vlgmr.msra.gmra.mxu1 %v2066_v16  ;;  %v2901_v16 = vld [vmem:[%s4809_s7 + $0x138] sm:$0xff] }
 0x666   : > { %v3446_v18 = vpop.f32.mrf.mxu0  ;;  %3523 = vmatpush3.msra.mxu1 %v2893_v15  ;;  %3554 = vmatprep.mubr.msk.f32.mxu1 %vm3766_vm9, %v3765_v12  ;;  %v2917_v15 = vld [vmem:[%s4809_s7 + $0x1b8] sm:$0xff] }
 0x667   : > { %3524 = vmatprep.subr.mxu1 %v3765_v12  ;;  %v2900_v18 = vld [vmem:[%s4809_s7 + $0x130] sm:$0xff] }
 0x668   : > { %v2226_v20 = vpop.f32.mrf.mxu0  ;;  %3525 = vmatpush3.msra.mxu1 %v2892_v17  ;;  %v2916_v17 = vld [vmem:[%s4809_s7 + $0x1b0] sm:$0xff] }
 0x669   : > { %3520 = vmatmul.mubr.f32.vlgmr.msra.gmra.mxu0 %v2226_v20  ;;  %3526 = vmatprep.subr.mxu1 %v3765_v12  ;;  %v2914_v20 = vld [vmem:[%s4809_s7 + $0x1a0] sm:$0xff] }
 0x66a   : > { %v3486_v22 = vpop.f32.mrf.mxu0  ;;  %3558 = vmatpush3.msra.mxu0 %v2344_v19  ;;  %3527 = vmatpush3.msra.mxu1 %v2891_v13  ;;  %v2915_v19 = vld [vmem:[%s4809_s7 + $0x1a8] sm:$0xff] }
 0x66b   : > { %3559 = vmatprep.subr.mxu0 %v3765_v12  ;;  %3528 = vmatprep.subr.mxu1 %v3765_v12  ;;  %v2899_v13 = vld [vmem:[%s4809_s7 + $0x128] sm:$0xff]  ;;  %v2897_v22 = vld [vmem:[%s4809_s7 + $0x118] sm:$0xff] }
 0x66c   : > { %3560 = vmatpush3.msra.mxu0 %v2343_v14  ;;  %3529 = vmatpush3.msra.mxu1 %v2890_v21  ;;  %v2898_v14 = vld [vmem:[%s4809_s7 + $0x120] sm:$0xff]  ;;  %v2913_v21 = vld [vmem:[%s4809_s7 + $0x198] sm:$0xff] }
 0x66d   : > { %3561 = vmatprep.subr.mxu0 %v3765_v12  ;;  %3530 = vmatprep.subr.mxu1 %v3765_v12 }
 0x66e   : > { %3562 = vmatpush3.msra.mxu0 %v2342_v23  ;;  %3531 = vmatpush3.msra.mxu1 %v2889_v24  ;;  %v2912_v23 = vld [vmem:[%s4809_s7 + $0x190] sm:$0xff] }
 0x66f   : > { %3563 = vmatprep.subr.mxu0 %v3765_v12  ;;  %3532 = vmatprep.subr.mxu1 %v3765_v12  ;;  %v2896_v24 = vld [vmem:[%s4809_s7 + $0x110] sm:$0xff] }
 0x670   : > { %3564 = vmatpush3.msra.mxu0 %v2341_v25  ;;  %3533 = vmatpush3.msra.mxu1 %v2888_v26  ;;  %v2911_v25 = vld [vmem:[%s4809_s7 + $0x188] sm:$0xff] }
 0x671   : > { %3565 = vmatprep.subr.mxu0 %v3765_v12  ;;  %3534 = vmatprep.subr.mxu1 %v3765_v12  ;;  %v2895_v26 = vld [vmem:[%s4809_s7 + $0x108] sm:$0xff] }
 0x672   : > { %3566 = vmatpush3.msra.mxu0 %v2340_v27  ;;  %3535 = vmatpush3.msra.mxu1 %v2887_v28  ;;  %v2910_v27 = vld [vmem:[%s4809_s7 + $0x180] sm:$0xff] }
 0x673   : > { %3567 = vmatprep.subr.mxu0 %v3765_v12  ;;  %3536 = vmatprep.subr.mxu1 %v3765_v12 }
 0x674   : > { %3568 = vmatpush3.msra.mxu0 %v2339_v29  ;;  %3537 = vmatpush3.msra.mxu1 %v2886_v31  ;;  %v2894_v29 = vld [vmem:[%s4809_s7 + $0x100] sm:$0xff] }
 0x675   : > { %3569 = vmatprep.subr.mxu0 %v3765_v12  ;;  %3538 = vmatprep.subr.mxu1 %v3765_v12 }
 0x676   : > { %3570 = vmatpush3.msra.mxu0 %v2338_v32  ;;  %3539 = vmatpush3.msra.mxu1 %v2885_v33 }
 0x677   : > { %3571 = vmatprep.subr.mxu0 %v3765_v12  ;;  %3540 = vmatprep.subr.mxu1 %v3765_v12 }
 0x678   : > { %3572 = vmatpush3.msra.mxu0 %v2337_v35  ;;  %3589 = vmatprep.mubr.msk.f32.mxu0 %vm3766_vm9, %v3765_v12 }
 0x679   : > { %3573 = vmatprep.subr.mxu0 %v3765_v12  ;;  %3541 = vmatpush3.msra.mxu1 %v2884_v38 }
 0x67a   : > { %3574 = vmatpush3.msra.mxu0 %v2336_v36  ;;  %3542 = vmatprep.subr.mxu1 %v3765_v12 }
 0x67b   : > { %3575 = vmatprep.subr.mxu0 %v3765_v12  ;;  %3543 = vmatpush3.msra.mxu1 %v2883_v40 }
 0x67c   : > { %3576 = vmatpush3.msra.mxu0 %v2335_v37  ;;  %3544 = vmatprep.subr.mxu1 %v3765_v12 }
 0x67d   : > { %3577 = vmatprep.subr.mxu0 %v3765_v12  ;;  %3545 = vmatpush3.msra.mxu1 %v2882_v42  ;;  %v2685_v42 = vld [vmem:[%s4810_s8] sm:$0x1] }
 0x67e   : > { %3578 = vmatpush3.msra.mxu0 %v2334_v39  ;;  %3546 = vmatprep.subr.mxu1 %v3765_v12 }
 0x67f   : > { %3579 = vmatprep.subr.mxu0 %v3765_v12  ;;  %3547 = vmatpush3.msra.mxu1 %v2881_v44 }
 0x680   : > { %3580 = vmatpush3.msra.mxu0 %v2333_v41  ;;  %3548 = vmatprep.subr.mxu1 %v3765_v12 }
 0x681   : > { %3581 = vmatprep.subr.mxu0 %v3765_v12  ;;  %3549 = vmatpush3.msra.mxu1 %v2880_v46 }
 0x682   : > { %3582 = vmatpush3.msra.mxu0 %v2332_v43  ;;  %3550 = vmatprep.subr.mxu1 %v3765_v12 }
 0x683   : > { %3583 = vmatprep.subr.mxu0 %v3765_v12  ;;  %3551 = vmatpush3.msra.mxu1 %v2879_v47 }
 0x684   : > { %3584 = vmatpush3.msra.mxu0 %v2331_v45  ;;  %3552 = vmatprep.subr.mxu1 %v3765_v12 }
 0x685   : > { %3585 = vmatprep.subr.mxu0 %v3765_v12  ;;  %3553 = vmatpush3.msra.mxu1 %v2878_v49 }
 0x686   : > { %3586 = vmatpush3.msra.mxu0 %v2330_v30  ;;  %3592 = vmatprep.subr.mxu1 %v3765_v12 }
 0x687   : > { %3587 = vmatprep.subr.mxu0 %v3765_v12 }
 0x688   : > { %3588 = vmatpush3.msra.mxu0 %v2329_v48 }
 0x689   : > { %3627 = vmatprep.subr.mxu0 %v3765_v12 }
 0x725   : > { %v2153_v34 = vpop.f32.mrf.mxu1 }
 0x726   : > { %v2157_v51 = vadd.f32 %v2153_v34, %v4491_v10  ;;  %v2918_v10 = vld [vmem:[%s4809_s7 + $0x1c0] sm:$0xff] }
 0x727   : > { %v3481_v50 = vpop.f32.mrf.mxu1 }
 0x729   : > { %v2313_v52 = vpop.f32.mrf.mxu0 }
 0x72a   : > { %v2317_v54 = vadd.f32 %v2313_v52, %v2157_v51 }
 0x72b   : > { %v3521_v55 = vpop.f32.mrf.mxu0 }
 0x72c   : > { %v2325_v56 = vadd.f32 %v2877_v53, %v2317_v54 }
 0x72e   : > { %v2327_v57 = vmul.f32 0.2, %v2325_v56  ;;  %vm2326_vm0 = vcmp.ge.f32.partialorder %v2325_v56, 0.0 }
 0x730   : > { %v4632_v59 = vsel %vm2326_vm0, %v2325_v56, %v2327_v57 }
 0x731   : > { %3590 = vmatmul.mubr.f32.vlgmr.msra.gmra.mxu0 %v4632_v59  ;;  %v2363_v60 = vrot.slane %v4632_v59, 1  ;;  %v2612_v28 = vrot.slane %v4632_v59, 3  ;;  %v2522_v31 = vrot.slane %v4632_v59, 2 }
 0x732   : > { %3628 = vmatpush3.msra.mxu0 %v2925_v58  ;;  %3659 = vmatprep.mubr.msk.f32.mxu0 %vm3766_vm9, %v3765_v12 }
 0x733   : > { %3629 = vmatprep.subr.mxu0 %v3765_v12  ;;  %3555 = vmatmul.mubr.f32.vlgmr.msra.gmra.mxu1 %v2363_v60 }
 0x734   : > { %3593 = vmatpush3.msra.mxu1 %v2909_v61  ;;  %3630 = vmatpush3.msra.mxu0 %v2924_v62 }
 0x735   : > { %3594 = vmatprep.subr.mxu1 %v3765_v12  ;;  %3631 = vmatprep.subr.mxu0 %v3765_v12 }
 0x736   : > { %3595 = vmatpush3.msra.mxu1 %v2908_v63  ;;  %3632 = vmatpush3.msra.mxu0 %v2923_v0 }
 0x737   : > { %3596 = vmatprep.subr.mxu1 %v3765_v12  ;;  %3633 = vmatprep.subr.mxu0 %v3765_v12 }
 0x738   : > { %3597 = vmatpush3.msra.mxu1 %v2907_v1  ;;  %3634 = vmatpush3.msra.mxu0 %v2922_v2 }
 0x739   : > { %3598 = vmatprep.subr.mxu1 %v3765_v12  ;;  %3635 = vmatprep.subr.mxu0 %v3765_v12 }
 0x73a   : > { %3599 = vmatpush3.msra.mxu1 %v2906_v3  ;;  %3636 = vmatpush3.msra.mxu0 %v2921_v4 }
 0x73b   : > { %3600 = vmatprep.subr.mxu1 %v3765_v12  ;;  %3637 = vmatprep.subr.mxu0 %v3765_v12 }
 0x73c   : > { %3601 = vmatpush3.msra.mxu1 %v2905_v5  ;;  %3638 = vmatpush3.msra.mxu0 %v2920_v6 }
 0x73d   : > { %3602 = vmatprep.subr.mxu1 %v3765_v12  ;;  %3639 = vmatprep.subr.mxu0 %v3765_v12 }
 0x73e   : > { %3603 = vmatpush3.msra.mxu1 %v2904_v7  ;;  %3640 = vmatpush3.msra.mxu0 %v2919_v8 }
 0x73f   : > { %3604 = vmatprep.subr.mxu1 %v3765_v12  ;;  %3641 = vmatprep.subr.mxu0 %v3765_v12 }
 0x740   : > { %3605 = vmatpush3.msra.mxu1 %v2903_v9  ;;  %3642 = vmatpush3.msra.mxu0 %v2918_v10 }
 0x741   : > { %3606 = vmatprep.subr.mxu1 %v3765_v12  ;;  %3643 = vmatprep.subr.mxu0 %v3765_v12 }
 0x742   : > { %3607 = vmatpush3.msra.mxu1 %v2902_v11  ;;  %3644 = vmatpush3.msra.mxu0 %v2917_v15 }
 0x743   : > { %3608 = vmatprep.subr.mxu1 %v3765_v12  ;;  %3645 = vmatprep.subr.mxu0 %v3765_v12 }
 0x744   : > { %3609 = vmatpush3.msra.mxu1 %v2901_v16  ;;  %3646 = vmatpush3.msra.mxu0 %v2916_v17 }
 0x745   : > { %3610 = vmatprep.subr.mxu1 %v3765_v12  ;;  %3647 = vmatprep.subr.mxu0 %v3765_v12 }
 0x746   : > { %3611 = vmatpush3.msra.mxu1 %v2900_v18  ;;  %3648 = vmatpush3.msra.mxu0 %v2915_v19 }
 0x747   : > { %3612 = vmatprep.subr.mxu1 %v3765_v12  ;;  %3649 = vmatprep.subr.mxu0 %v3765_v12 }
 0x748   : > { %3613 = vmatpush3.msra.mxu1 %v2899_v13  ;;  %3650 = vmatpush3.msra.mxu0 %v2914_v20 }
 0x749   : > { %3614 = vmatprep.subr.mxu1 %v3765_v12  ;;  %3651 = vmatprep.subr.mxu0 %v3765_v12 }
 0x74a   : > { %3615 = vmatpush3.msra.mxu1 %v2898_v14  ;;  %3652 = vmatpush3.msra.mxu0 %v2913_v21 }
 0x74b   : > { %3616 = vmatprep.subr.mxu1 %v3765_v12  ;;  %3653 = vmatprep.subr.mxu0 %v3765_v12 }
 0x74c   : > { %3617 = vmatpush3.msra.mxu1 %v2897_v22  ;;  %3654 = vmatpush3.msra.mxu0 %v2912_v23 }
 0x74d   : > { %3618 = vmatprep.subr.mxu1 %v3765_v12  ;;  %3655 = vmatprep.subr.mxu0 %v3765_v12 }
 0x74e   : > { %3619 = vmatpush3.msra.mxu1 %v2896_v24  ;;  %3656 = vmatpush3.msra.mxu0 %v2911_v25 }
 0x74f   : > { %3620 = vmatprep.subr.mxu1 %v3765_v12  ;;  %3657 = vmatprep.subr.mxu0 %v3765_v12 }
 0x750   : > { %3621 = vmatpush3.msra.mxu1 %v2895_v26  ;;  %3658 = vmatpush3.msra.mxu0 %v2910_v27 }
 0x751   : > { %3622 = vmatprep.subr.mxu1 %v3765_v12  ;;  %3660 = vmatmul.mubr.f32.vlgmr.msra.gmra.mxu0 %v2612_v28 }
 0x752   : > { %3623 = vmatpush3.msra.mxu1 %v2894_v29  ;;  %3624 = vmatprep.mubr.msk.f32.mxu1 %vm3766_vm9, %v3765_v12 }
 0x753   : > { %3625 = vmatmul.mubr.f32.vlgmr.msra.gmra.mxu1 %v2522_v31 }
 0x7f1   : > { %v2501_v32 = vpop.f32.mrf.mxu0 }
 0x7f3   : > { %v2431_v33 = vpop.f32.mrf.mxu1  ;;  %v3591_v35 = vpop.f32.mrf.mxu0 }
 0x7f4   : > { %v2502_v38 = vadd.f32 %v2501_v32, %v2431_v33 }
 0x7f5   : > { %v3556_v36 = vpop.f32.mrf.mxu1 }
 0x811   : > { %v2680_v37 = vpop.f32.mrf.mxu0 }
 0x813   : > { %v2590_v39 = vpop.f32.mrf.mxu1  ;;  %v3661_v40 = vpop.f32.mrf.mxu0 }
 0x814   : > { %v2594_v41 = vadd.f32 %v2590_v39, %v2502_v38 }
 0x815   : > { %v3626_v43 = vpop.f32.mrf.mxu1 }
 0x816   : > { %v2684_v12 = vadd.f32 %v2680_v37, %v2594_v41 }
 0x818   : > { %v2686_v44 = vadd.f32 %v2685_v42, %v2684_v12 }
 0x81a   : > { %2688 = vst.msk [vmem:[%s324_s28] sm:$0x1] %vm2687_vm1, %v2686_v44 }
 0x81b   : > { %3716 = shalt.err (!%p3713_p3)
}
 0x81c   : > { %s3717_s26 = scalar_lea.hbm %s2700_s17, 16  ;;  %s3721_s28 = scalar_lea.hbm %s4811_s9, 32 }
 0x81d   : > { %p3718_p4 = scmp.ne.s32.totalorder %s2700_s17, %s3717_s26  ;;  %p3722_p9 = scmp.lt.s32.totalorder %s2700_s17, %s4811_s9 }
 0x81e   : > { %p3723_p10 = scmp.lt.s32.totalorder %s3721_s28, %s3717_s26 }
 0x81f   : > { %p3719_p7 = pnand %p3718_p4, %p3856_p5 }
 0x820   : > { %p3724_p11 = por %p3723_p10, %p3722_p9 }
 0x821   : > { %p3720_p8 = pneg %p3719_p7 }
 0x823   : > { %p3725_p12 = pnand %p3724_p11, %p3720_p8 }
 0x825   : > { %3728 = shalt.err (!%p3725_p12)
}
 0x826   : > { %3662 = dma.vmem_to_hbm [thread:$0]  (%p3856_p5), %s2703_s29, 16, %s2700_s17, %s2690_s21  }
 0x827 PF: > { %p3668_p13 = scmp.ge.s32.totalorder %s3763_s12, 2  ;;  %s2714_s22 = sand.u32 1, %s3751_s30  }
 0x828   : > { %s2715_s23 = scalar_lea.sflag [#allocation3], %s2714_s22 }
 0x829   : > { %p3665_p0 = pnand %p3668_p13, %p3860_p6 }
 0x82b   : > { %p3666_p1 = pneg %p3665_p0 }
 0x82d   : > { %3746 = dma.done.wait (%p3666_p1), %s2715_s23, 16  }
 0x82e   : > { %3748 = vsyncadd (%p3666_p1), %s2715_s23, 4294967280  ;;  %p19_p2 = scmp.ge.s32.totalorder %s3843_s15, 4   ;;  %s4814_s30 = smov %s3755_s10 }
 0x82f   : > { %s4815_s10 = smov %s3759_s11  ;;  %s4816_s11 = smov %s3854_s18 }
 0x830   : > { %s4817_s12 = smov %s3843_s15  ;;  %21 = sbr.rel (!%p19_p2) target bundleno = 3 (0x3), region = 103 }
 0x835   :  { %2719 = vsyncpa [#allocation3], 1 }
 0x836   :  { %2721 = vsyncpa [#allocation3 + $0x1], 1 }

</bundles_post_ra>
